<compile_context>
chip_gen: v7x
topology: tpu7x:2x2x1
jax: 0.10.0
libtpu: 0.0.40
codegen_flags: <defaults>
</compile_context>

<pallas_src>
import functools
import math

import jax
import jax.numpy as jnp
from jax import lax
from jax.experimental import pallas as pl
from jax.experimental.pallas import tpu as pltpu


def _vmem_limit_bytes():
    """Generation-aware VMEM budget (~85% of physical, capped at 110 MiB)."""
    cap = 64 * 1024 * 1024  # safe default (v7x physical)
    try:
        info = pltpu.get_tpu_info()
        cap = int(getattr(info, "vmem_capacity_bytes", cap) or cap)
    except Exception:
        pass
    return min(int(cap * 0.85), 110 * 1024 * 1024)


_VMEM_LIMIT = _vmem_limit_bytes()


def _pick_tile(dim, target, align=8):
    """Largest divisor of `dim` that is <= target and `align`-aligned (else any
    divisor <= target, else the full dim)."""
    if dim <= target:
        return dim
    for t in range(target, 0, -1):
        if dim % t == 0 and t % align == 0:
            return t
    for t in range(target, 0, -1):
        if dim % t == 0:
            return t
    return dim


# ----------------------------------------------------------------------------
# Tiled linear (matmul + bias [+ relu]) kernel
# ----------------------------------------------------------------------------

def _matmul_kernel(x_ref, w_ref, b_ref, o_ref, acc_ref, *, activation):
    @pl.when(pl.program_id(2) == 0)
    def _init():
        acc_ref[...] = jnp.zeros_like(acc_ref)

    acc_ref[...] += jnp.dot(
        x_ref[...].astype(jnp.bfloat16),
        w_ref[...].astype(jnp.bfloat16),
        preferred_element_type=jnp.float32,
    )

    @pl.when(pl.program_id(2) == pl.num_programs(2) - 1)
    def _finalize():
        y = acc_ref[...] + b_ref[...].astype(jnp.float32)
        if activation == "relu":
            y = jnp.maximum(y, 0.0)
        o_ref[...] = y.astype(o_ref.dtype)


def linear(x2d, w, b, activation=None, out_dtype=None, *, tm=256, tn=512, tk=512):
    m, k = x2d.shape
    n = w.shape[1]
    out_dtype = out_dtype or x2d.dtype
    tm = _pick_tile(m, tm, 8)
    tn = _pick_tile(n, tn, 128)
    tk = _pick_tile(k, tk, 128)
    grid = (m // tm, n // tn, k // tk)

    cost = pl.CostEstimate(
        flops=2 * m * n * k,
        transcendentals=0,
        bytes_accessed=(jnp.dtype(x2d.dtype).itemsize * m * k
                        + jnp.dtype(w.dtype).itemsize * k * n
                        + jnp.dtype(out_dtype).itemsize * m * n + 4 * n),
    )
    return pl.pallas_call(
        functools.partial(_matmul_kernel, activation=activation),
        out_shape=jax.ShapeDtypeStruct((m, n), out_dtype),
        grid=grid,
        in_specs=[
            pl.BlockSpec((tm, tk), lambda i, j, kk: (i, kk)),
            pl.BlockSpec((tk, tn), lambda i, j, kk: (kk, j)),
            pl.BlockSpec((1, tn), lambda i, j, kk: (0, j)),
        ],
        out_specs=pl.BlockSpec((tm, tn), lambda i, j, kk: (i, j)),
        scratch_shapes=[pltpu.VMEM((tm, tn), jnp.float32)],
        compiler_params=pltpu.CompilerParams(
            dimension_semantics=("parallel", "parallel", "arbitrary"),
            vmem_limit_bytes=_VMEM_LIMIT,
        ),
        cost_estimate=cost,
    )(x2d, w, b.reshape(1, n))


# ----------------------------------------------------------------------------
# Matmul with fused bias + residual add + LayerNorm epilogue (tn == full N)
# ----------------------------------------------------------------------------

def _matmul_resln_kernel(x_ref, w_ref, b_ref, r_ref, g_ref, be_ref, o_ref,
                         acc_ref, *, eps):
    @pl.when(pl.program_id(1) == 0)
    def _init():
        acc_ref[...] = jnp.zeros_like(acc_ref)

    acc_ref[...] += jnp.dot(
        x_ref[...].astype(jnp.bfloat16),
        w_ref[...].astype(jnp.bfloat16),
        preferred_element_type=jnp.float32,
    )

    @pl.when(pl.program_id(1) == pl.num_programs(1) - 1)
    def _finalize():
        y = (acc_ref[...] + b_ref[...].astype(jnp.float32)
             + r_ref[...].astype(jnp.float32))
        # one-pass row statistics: E[y], E[y^2]
        mean = jnp.mean(y, axis=-1, keepdims=True)
        var = jnp.maximum(jnp.mean(y * y, axis=-1, keepdims=True) - mean * mean, 0.0)
        yn = (y - mean) * lax.rsqrt(var + eps)
        o_ref[...] = (yn * g_ref[...].astype(jnp.float32)
                      + be_ref[...].astype(jnp.float32)).astype(o_ref.dtype)


def linear_residual_ln(x2d, w, b, res2d, gamma, beta, eps=1e-5, *, tm=256, tk=512):
    """out = LayerNorm(res2d + x2d @ w + b); requires one N tile (n <= 2048)."""
    m, k = x2d.shape
    n = w.shape[1]
    if n > 2048:  # fall back to un-fused path for very wide rows
        y = linear(x2d, w, b, out_dtype=res2d.dtype)
        return add_layer_norm(y, res2d, gamma, beta, eps)

    tm = _pick_tile(m, tm, 8)
    tk = _pick_tile(k, tk, 128)
    grid = (m // tm, k // tk)
    cost = pl.CostEstimate(
        flops=2 * m * n * k + 8 * m * n,
        transcendentals=0,
        bytes_accessed=(jnp.dtype(x2d.dtype).itemsize * m * k
                        + jnp.dtype(w.dtype).itemsize * k * n
                        + 4 * 2 * m * n + 4 * 3 * n),
    )
    return pl.pallas_call(
        functools.partial(_matmul_resln_kernel, eps=eps),
        out_shape=jax.ShapeDtypeStruct((m, n), res2d.dtype),
        grid=grid,
        in_specs=[
            pl.BlockSpec((tm, tk), lambda i, kk: (i, kk)),
            pl.BlockSpec((tk, n), lambda i, kk: (kk, 0)),
            pl.BlockSpec((1, n), lambda i, kk: (0, 0)),
            pl.BlockSpec((tm, n), lambda i, kk: (i, 0)),
            pl.BlockSpec((1, n), lambda i, kk: (0, 0)),
            pl.BlockSpec((1, n), lambda i, kk: (0, 0)),
        ],
        out_specs=pl.BlockSpec((tm, n), lambda i, kk: (i, 0)),
        scratch_shapes=[pltpu.VMEM((tm, n), jnp.float32)],
        compiler_params=pltpu.CompilerParams(
            dimension_semantics=("parallel", "arbitrary"),
            vmem_limit_bytes=_VMEM_LIMIT,
        ),
        cost_estimate=cost,
    )(x2d, w, b.reshape(1, n), res2d, gamma.reshape(1, n), beta.reshape(1, n))


# ----------------------------------------------------------------------------
# Standalone fused residual-add + LayerNorm (fallback path only)
# ----------------------------------------------------------------------------

def _add_ln_kernel(x_ref, r_ref, g_ref, b_ref, o_ref, *, eps):
    y = x_ref[...].astype(jnp.float32) + r_ref[...].astype(jnp.float32)
    mean = jnp.mean(y, axis=-1, keepdims=True)
    var = jnp.maximum(jnp.mean(y * y, axis=-1, keepdims=True) - mean * mean, 0.0)
    yn = (y - mean) * lax.rsqrt(var + eps)
    o_ref[...] = (yn * g_ref[...].astype(jnp.float32)
                  + b_ref[...].astype(jnp.float32)).astype(o_ref.dtype)


def add_layer_norm(x2d, res2d, gamma, beta, eps=1e-5, *, tr=512):
    n, d = x2d.shape
    tr = _pick_tile(n, tr, 8)
    return pl.pallas_call(
        functools.partial(_add_ln_kernel, eps=eps),
        out_shape=jax.ShapeDtypeStruct((n, d), res2d.dtype),
        grid=(n // tr,),
        in_specs=[
            pl.BlockSpec((tr, d), lambda i: (i, 0)),
            pl.BlockSpec((tr, d), lambda i: (i, 0)),
            pl.BlockSpec((1, d), lambda i: (0, 0)),
            pl.BlockSpec((1, d), lambda i: (0, 0)),
        ],
        out_specs=pl.BlockSpec((tr, d), lambda i: (i, 0)),
        compiler_params=pltpu.CompilerParams(
            dimension_semantics=("parallel",),
            vmem_limit_bytes=_VMEM_LIMIT,
        ),
    )(x2d, res2d, gamma.reshape(1, d), beta.reshape(1, d))


# ----------------------------------------------------------------------------
# Flash attention (online softmax), grid = (B*H, q-tiles, kv-tiles)
# ----------------------------------------------------------------------------

def _flash_kernel(q_ref, k_ref, v_ref, o_ref, m_sc, l_sc, acc_sc,
                  *, scale, causal, tq, tkv):
    qi = pl.program_id(1)
    kv = pl.program_id(2)

    @pl.when(kv == 0)
    def _init():
        m_sc[...] = jnp.full_like(m_sc, -1e30)
        l_sc[...] = jnp.zeros_like(l_sc)
        acc_sc[...] = jnp.zeros_like(acc_sc)

    def _compute():
        # pre-scale q in f32, then bf16 operands into the MXU
        q = (q_ref[0].astype(jnp.float32) * scale).astype(jnp.bfloat16)
        k = k_ref[0].astype(jnp.bfloat16)
        v = v_ref[0].astype(jnp.bfloat16)
        # contract last axes (no XLU transpose), f32 scores
        s = lax.dot_general(q, k, (((1,), (1,)), ((), ())),
                            preferred_element_type=jnp.float32)
        if causal:
            row = qi * tq + lax.broadcasted_iota(jnp.int32, (tq, tkv), 0)
            col = kv * tkv + lax.broadcasted_iota(jnp.int32, (tq, tkv), 1)
            s = jnp.where(col <= row, s, -1e30)
        m_prev = m_sc[...]
        m_new = jnp.maximum(m_prev, jnp.max(s, axis=-1, keepdims=True))
        alpha = jnp.exp(m_prev - m_new)
        p = jnp.exp(s - m_new)
        l_sc[...] = alpha * l_sc[...] + jnp.sum(p, axis=-1, keepdims=True)
        acc_sc[...] = alpha * acc_sc[...] + jnp.dot(
            p.astype(jnp.bfloat16), v, preferred_element_type=jnp.float32)
        m_sc[...] = m_new

    if causal:
        # skip KV tiles that are entirely above the diagonal
        pl.when(kv * tkv <= qi * tq + (tq - 1))(_compute)
    else:
        _compute()

    @pl.when(kv == pl.num_programs(2) - 1)
    def _finalize():
        inv = pl.reciprocal(l_sc[...], approx=True)
        o_ref[0] = (acc_sc[...] * inv).astype(o_ref.dtype)


def flash_attention(q, k, v, *, causal, scale, tq=256, tkv=256):
    """q, k, v: (B*H, S, Dh) head-major arrays (Dh on the lane axis)."""
    bh, sq, dh = q.shape
    skv = k.shape[1]
    tq = _pick_tile(sq, tq, 8)
    tkv = _pick_tile(skv, tkv, 8)
    grid = (bh, sq // tq, skv // tkv)
    itemsize = jnp.dtype(q.dtype).itemsize

    return pl.pallas_call(
        functools.partial(_flash_kernel, scale=scale, causal=causal,
                          tq=tq, tkv=tkv),
        out_shape=jax.ShapeDtypeStruct((bh, sq, dh), q.dtype),
        grid=grid,
        in_specs=[
            pl.BlockSpec((1, tq, dh), lambda b, i, j: (b, i, 0)),
            pl.BlockSpec((1, tkv, dh), lambda b, i, j: (b, j, 0)),
            pl.BlockSpec((1, tkv, dh), lambda b, i, j: (b, j, 0)),
        ],
        out_specs=pl.BlockSpec((1, tq, dh), lambda b, i, j: (b, i, 0)),
        scratch_shapes=[
            pltpu.VMEM((tq, 1), jnp.float32),
            pltpu.VMEM((tq, 1), jnp.float32),
            pltpu.VMEM((tq, dh), jnp.float32),
        ],
        compiler_params=pltpu.CompilerParams(
            dimension_semantics=("parallel", "parallel", "arbitrary"),
            vmem_limit_bytes=_VMEM_LIMIT,
        ),
        cost_estimate=pl.CostEstimate(
            flops=4 * bh * sq * skv * dh,
            transcendentals=bh * sq * skv,
            bytes_accessed=itemsize * bh * (2 * sq * dh + 2 * skv * dh),
        ),
    )(q, k, v)


# ----------------------------------------------------------------------------
# Transformer layers built from the kernels (glue in plain JAX)
# ----------------------------------------------------------------------------

def self_attn_context(x, p, num_heads, causal=False):
    """Fused QKV projection + flash attention; returns pre-projection context."""
    b, s, d = x.shape
    dh = d // num_heads
    qkv = linear(x.reshape(b * s, d), p["wqkv"], p["bqkv"], out_dtype=jnp.bfloat16)
    qkv = qkv.reshape(b, s, 3, num_heads, dh).transpose(2, 0, 3, 1, 4)  # (3,B,H,S,Dh)
    q = qkv[0].reshape(b * num_heads, s, dh)
    k = qkv[1].reshape(b * num_heads, s, dh)
    v = qkv[2].reshape(b * num_heads, s, dh)
    attn = flash_attention(q, k, v, causal=causal, scale=1.0 / math.sqrt(dh))
    return attn.reshape(b, num_heads, s, dh).transpose(0, 2, 1, 3).reshape(b * s, d)


def cross_attn_context(x_q, x_kv, p, num_heads):
    b, sq, d = x_q.shape
    skv = x_kv.shape[1]
    dh = d // num_heads
    q = linear(x_q.reshape(b * sq, d), p["wq"], p["bq"], out_dtype=jnp.bfloat16)
    kv = linear(x_kv.reshape(b * skv, d), p["wkv"], p["bkv"], out_dtype=jnp.bfloat16)
    q = q.reshape(b, sq, num_heads, dh).transpose(0, 2, 1, 3).reshape(b * num_heads, sq, dh)
    kv = kv.reshape(b, skv, 2, num_heads, dh).transpose(2, 0, 3, 1, 4)  # (2,B,H,S,Dh)
    k = kv[0].reshape(b * num_heads, skv, dh)
    v = kv[1].reshape(b * num_heads, skv, dh)
    attn = flash_attention(q, k, v, causal=False, scale=1.0 / math.sqrt(dh))
    return attn.reshape(b, num_heads, sq, dh).transpose(0, 2, 1, 3).reshape(b * sq, d)


def encoder_layer(x, p, num_heads):
    b, s, d = x.shape
    x2d = x.reshape(b * s, d)
    ctx = self_attn_context(x, p["self_attn"], num_heads)
    x1 = linear_residual_ln(ctx, p["self_attn"]["wo"], p["self_attn"]["bo"],
                            x2d, p["ln1_g"], p["ln1_b"])
    h = linear(x1, p["ffn"]["w1"], p["ffn"]["b1"], activation="relu",
               out_dtype=jnp.bfloat16)
    x2 = linear_residual_ln(h, p["ffn"]["w2"], p["ffn"]["b2"],
                            x1, p["ln2_g"], p["ln2_b"])
    return x2.reshape(b, s, d)


def decoder_layer(y, enc, p, num_heads):
    b, s, d = y.shape
    y2d = y.reshape(b * s, d)
    ctx = self_attn_context(y, p["self_attn"], num_heads, causal=True)
    y1 = linear_residual_ln(ctx, p["self_attn"]["wo"], p["self_attn"]["bo"],
                            y2d, p["ln1_g"], p["ln1_b"])
    ctx2 = cross_attn_context(y1.reshape(b, s, d), enc, p["cross_attn"], num_heads)
    y2 = linear_residual_ln(ctx2, p["cross_attn"]["wo"], p["cross_attn"]["bo"],
                            y1, p["ln2_g"], p["ln2_b"])
    h = linear(y2, p["ffn"]["w1"], p["ffn"]["b1"], activation="relu",
               out_dtype=jnp.bfloat16)
    y3 = linear_residual_ln(h, p["ffn"]["w2"], p["ffn"]["b2"],
                            y2, p["ln3_g"], p["ln3_b"])
    return y3.reshape(b, s, d)


def transformer_forward(source, target, params, *, num_heads):
    enc = source
    for lp in params["encoder"]:
        enc = encoder_layer(enc, lp, num_heads)
    dec = target
    for lp in params["decoder"]:
        dec = decoder_layer(dec, enc, lp, num_heads)
    return dec


# ----------------------------------------------------------------------------
# Deterministic parameter initialization (bf16 weights, Q/K/V pre-fused)
# ----------------------------------------------------------------------------

_WDTYPE = jnp.bfloat16  # weights stored bf16 in HBM (f32 accumulation in-kernel)


def _self_attn_params(key, d):
    ks = jax.random.split(key, 4)
    mk = lambda k: (jax.random.normal(k, (d, d), jnp.float32) * 0.02)
    wq, wk, wv, wo = (mk(k) for k in ks)
    return {
        "wqkv": jnp.concatenate([wq, wk, wv], axis=1).astype(_WDTYPE),
        "bqkv": jnp.zeros((3 * d,), jnp.float32),
        "wo": wo.astype(_WDTYPE), "bo": jnp.zeros((d,), jnp.float32),
    }


def _cross_attn_params(key, d):
    ks = jax.random.split(key, 4)
    mk = lambda k: (jax.random.normal(k, (d, d), jnp.float32) * 0.02)
    wq, wk, wv, wo = (mk(k) for k in ks)
    return {
        "wq": wq.astype(_WDTYPE), "bq": jnp.zeros((d,), jnp.float32),
        "wkv": jnp.concatenate([wk, wv], axis=1).astype(_WDTYPE),
        "bkv": jnp.zeros((2 * d,), jnp.float32),
        "wo": wo.astype(_WDTYPE), "bo": jnp.zeros((d,), jnp.float32),
    }


def _ffn_params(key, d, expand):
    k1, k2 = jax.random.split(key)
    return {
        "w1": (jax.random.normal(k1, (d, d * expand), jnp.float32) * 0.02).astype(_WDTYPE),
        "b1": jnp.zeros((d * expand,), jnp.float32),
        "w2": (jax.random.normal(k2, (d * expand, d), jnp.float32) * 0.02).astype(_WDTYPE),
        "b2": jnp.zeros((d,), jnp.float32),
    }


def init_params(key, d, expand, num_layers):
    enc_layers, dec_layers = [], []
    for _ in range(num_layers):
        key, k1, k2 = jax.random.split(key, 3)
        enc_layers.append({
            "self_attn": _self_attn_params(k1, d),
            "ffn": _ffn_params(k2, d, expand),
            "ln1_g": jnp.ones((d,), jnp.float32), "ln1_b": jnp.zeros((d,), jnp.float32),
            "ln2_g": jnp.ones((d,), jnp.float32), "ln2_b": jnp.zeros((d,), jnp.float32),
        })
    for _ in range(num_layers):
        key, k1, k2, k3 = jax.random.split(key, 4)
        dec_layers.append({
            "self_attn": _self_attn_params(k1, d),
            "cross_attn": _cross_attn_params(k2, d),
            "ffn": _ffn_params(k3, d, expand),
            "ln1_g": jnp.ones((d,), jnp.float32), "ln1_b": jnp.zeros((d,), jnp.float32),
            "ln2_g": jnp.ones((d,), jnp.float32), "ln2_b": jnp.zeros((d,), jnp.float32),
            "ln3_g": jnp.ones((d,), jnp.float32), "ln3_b": jnp.zeros((d,), jnp.float32),
        })
    return {"encoder": enc_layers, "decoder": dec_layers}


# ----------------------------------------------------------------------------
# Main
# ----------------------------------------------------------------------------

if __name__ == "__main__":
    B, S, D = 2, 8, 32          # batch, seq, embedding
    NUM_HEADS = 4               # Dh = 8
    FFN_EXPAND = 4
    NUM_LAYERS = 2

    key = jax.random.PRNGKey(0)
    k_params, k_src, k_tgt = jax.random.split(key, 3)

    params = init_params(k_params, D, FFN_EXPAND, NUM_LAYERS)
    source = jax.random.normal(k_src, (B, S, D), jnp.float32)
    target = jax.random.normal(k_tgt, (B, S, D), jnp.float32)

    fwd = jax.jit(functools.partial(transformer_forward, num_heads=NUM_HEADS))
    out = fwd(source, target, params)
    out = jax.block_until_ready(out)
    assert out.shape == (B, S, D)
    assert bool(jnp.all(jnp.isfinite(out)))
    print("KERNEL_OK")
</pallas_src>

<mosaic_0001>
module attributes {stable_mosaic.version = 11 : i64} {
  func.func @_matmul_kernel(%arg0: i32, %arg1: i32, %arg2: i32, %arg3: memref<16x32xf32, #tpu.memory_space<vmem>>, %arg4: memref<32x96xbf16, #tpu.memory_space<vmem>>, %arg5: memref<1x96xf32, #tpu.memory_space<vmem>>, %arg6: memref<16x96xbf16, #tpu.memory_space<vmem>>, %arg7: memref<16x96xf32, #tpu.memory_space<vmem>>) attributes {dimension_semantics = [#tpu.dimension_semantics<parallel>, #tpu.dimension_semantics<parallel>, #tpu.dimension_semantics<arbitrary>], iteration_bounds = array<i64: 1, 1, 1>, scalar_prefetch = 0 : i64, scratch_operands = 1 : i64, tpu.core_type = #tpu.core_type<tc>, window_params = [{transform_indices = @transform_0, window_bounds = array<i64: 16, 32>}, {transform_indices = @transform_1, window_bounds = array<i64: 32, 96>}, {transform_indices = @transform_2, window_bounds = array<i64: 1, 96>}, {transform_indices = @transform_3, window_bounds = array<i64: 16, 96>}]} {
    %c0_i32 = arith.constant 0 : i32
    %0 = arith.cmpi eq, %arg2, %c0_i32 : i32
    %1 = arith.extui %0 : i1 to i32
    %c0_i32_0 = arith.constant 0 : i32
    %2 = arith.cmpi ne, %1, %c0_i32_0 : i32
    scf.if %2 {
      %cst_10 = arith.constant 0.000000e+00 : f32
      %13 = vector.broadcast %cst_10 : f32 to vector<16x96xf32>
      %c0_11 = arith.constant 0 : index
      %c0_12 = arith.constant 0 : index
      %14 = vector.load %arg7[%c0_11, %c0_12] : memref<16x96xf32, #tpu.memory_space<vmem>>, vector<16x96xf32>
      tpu.vector_store %arg7[%c0_11, %c0_12], %13 {strides = array<i32>} : memref<16x96xf32, #tpu.memory_space<vmem>>, vector<16x96xf32>,
    } else {
    }
    %c0 = arith.constant 0 : index
    %c0_1 = arith.constant 0 : index
    %3 = vector.load %arg7[%c0, %c0_1] : memref<16x96xf32, #tpu.memory_space<vmem>>, vector<16x96xf32>
    %c0_2 = arith.constant 0 : index
    %c0_3 = arith.constant 0 : index
    %4 = vector.load %arg3[%c0_2, %c0_3] : memref<16x32xf32, #tpu.memory_space<vmem>>, vector<16x32xf32>
    %5 = arith.truncf %4 : vector<16x32xf32> to vector<16x32xbf16>
    %c0_4 = arith.constant 0 : index
    %c0_5 = arith.constant 0 : index
    %6 = vector.load %arg4[%c0_4, %c0_5] : memref<32x96xbf16, #tpu.memory_space<vmem>>, vector<32x96xbf16>
    %cst = arith.constant dense<0.000000e+00> : vector<16x96xf32>
    %7 = tpu.matmul %5, %6, %cst {dimension_numbers = #tpu.dot_dimension_numbers<[1], [0], [0], [1], [0, 0, 1, 1], [], []>} : vector<16x32xbf16>, vector<32x96xbf16>, vector<16x96xf32> -> vector<16x96xf32>
    %8 = arith.addf %3, %7 : vector<16x96xf32>
    %c0_6 = arith.constant 0 : index
    %c0_7 = arith.constant 0 : index
    %9 = vector.load %arg7[%c0_6, %c0_7] : memref<16x96xf32, #tpu.memory_space<vmem>>, vector<16x96xf32>
    tpu.vector_store %arg7[%c0_6, %c0_7], %8 {strides = array<i32>} : memref<16x96xf32, #tpu.memory_space<vmem>>, vector<16x96xf32>,
    %c0_i32_8 = arith.constant 0 : i32
    %10 = arith.cmpi eq, %arg2, %c0_i32_8 : i32
    %11 = arith.extui %10 : i1 to i32
    %c0_i32_9 = arith.constant 0 : i32
    %12 = arith.cmpi ne, %11, %c0_i32_9 : i32
    scf.if %12 {
      %c0_10 = arith.constant 0 : index
      %c0_11 = arith.constant 0 : index
      %13 = vector.load %arg7[%c0_10, %c0_11] : memref<16x96xf32, #tpu.memory_space<vmem>>, vector<16x96xf32>
      %c0_12 = arith.constant 0 : index
      %c0_13 = arith.constant 0 : index
      %14 = vector.load %arg5[%c0_12, %c0_13] : memref<1x96xf32, #tpu.memory_space<vmem>>, vector<1x96xf32>
      %15 = vector.broadcast %14 : vector<1x96xf32> to vector<16x96xf32>
      %16 = arith.addf %13, %15 : vector<16x96xf32>
      %17 = arith.truncf %16 : vector<16x96xf32> to vector<16x96xbf16>
      %c0_14 = arith.constant 0 : index
      %c0_15 = arith.constant 0 : index
      %18 = vector.load %arg6[%c0_14, %c0_15] : memref<16x96xbf16, #tpu.memory_space<vmem>>, vector<16x96xbf16>
      tpu.vector_store %arg6[%c0_14, %c0_15], %17 {strides = array<i32>} : memref<16x96xbf16, #tpu.memory_space<vmem>>, vector<16x96xbf16>,
    } else {
    }
    return
  }
  func.func @transform_0(%arg0: i32, %arg1: i32, %arg2: i32) -> (i32, i32) {
    %c0_i32 = arith.constant 0 : i32
    return %arg0, %arg2 : i32, i32
  }
  func.func @transform_1(%arg0: i32, %arg1: i32, %arg2: i32) -> (i32, i32) {
    %c0_i32 = arith.constant 0 : i32
    return %arg2, %arg1 : i32, i32
  }
  func.func @transform_2(%arg0: i32, %arg1: i32, %arg2: i32) -> (i32, i32) {
    %c0_i32 = arith.constant 0 : i32
    %c0_i32_0 = arith.constant 0 : i32
    return %c0_i32, %arg1 : i32, i32
  }
  func.func @transform_3(%arg0: i32, %arg1: i32, %arg2: i32) -> (i32, i32) {
    %c0_i32 = arith.constant 0 : i32
    return %arg0, %arg1 : i32, i32
  }
}

module attributes {stable_mosaic.version = 11 : i64} {
  func.func @_matmul_kernel(%arg0: i32, %arg1: i32, %arg2: i32, %arg3: memref<16x32xf32, #tpu.memory_space<vmem>>, %arg4: memref<32x32xbf16, #tpu.memory_space<vmem>>, %arg5: memref<1x32xf32, #tpu.memory_space<vmem>>, %arg6: memref<16x32xbf16, #tpu.memory_space<vmem>>, %arg7: memref<16x32xf32, #tpu.memory_space<vmem>>) attributes {dimension_semantics = [#tpu.dimension_semantics<parallel>, #tpu.dimension_semantics<parallel>, #tpu.dimension_semantics<arbitrary>], iteration_bounds = array<i64: 1, 1, 1>, scalar_prefetch = 0 : i64, scratch_operands = 1 : i64, tpu.core_type = #tpu.core_type<tc>, window_params = [{transform_indices = @transform_0, window_bounds = array<i64: 16, 32>}, {transform_indices = @transform_1, window_bounds = array<i64: 32, 32>}, {transform_indices = @transform_2, window_bounds = array<i64: 1, 32>}, {transform_indices = @transform_3, window_bounds = array<i64: 16, 32>}]} {
    %c0_i32 = arith.constant 0 : i32
    %0 = arith.cmpi eq, %arg2, %c0_i32 : i32
    %1 = arith.extui %0 : i1 to i32
    %c0_i32_0 = arith.constant 0 : i32
    %2 = arith.cmpi ne, %1, %c0_i32_0 : i32
    scf.if %2 {
      %cst_10 = arith.constant 0.000000e+00 : f32
      %13 = vector.broadcast %cst_10 : f32 to vector<16x32xf32>
      %c0_11 = arith.constant 0 : index
      %c0_12 = arith.constant 0 : index
      %14 = vector.load %arg7[%c0_11, %c0_12] : memref<16x32xf32, #tpu.memory_space<vmem>>, vector<16x32xf32>
      tpu.vector_store %arg7[%c0_11, %c0_12], %13 {strides = array<i32>} : memref<16x32xf32, #tpu.memory_space<vmem>>, vector<16x32xf32>,
    } else {
    }
    %c0 = arith.constant 0 : index
    %c0_1 = arith.constant 0 : index
    %3 = vector.load %arg7[%c0, %c0_1] : memref<16x32xf32, #tpu.memory_space<vmem>>, vector<16x32xf32>
    %c0_2 = arith.constant 0 : index
    %c0_3 = arith.constant 0 : index
    %4 = vector.load %arg3[%c0_2, %c0_3] : memref<16x32xf32, #tpu.memory_space<vmem>>, vector<16x32xf32>
    %5 = arith.truncf %4 : vector<16x32xf32> to vector<16x32xbf16>
    %c0_4 = arith.constant 0 : index
    %c0_5 = arith.constant 0 : index
    %6 = vector.load %arg4[%c0_4, %c0_5] : memref<32x32xbf16, #tpu.memory_space<vmem>>, vector<32x32xbf16>
    %cst = arith.constant dense<0.000000e+00> : vector<16x32xf32>
    %7 = tpu.matmul %5, %6, %cst {dimension_numbers = #tpu.dot_dimension_numbers<[1], [0], [0], [1], [0, 0, 1, 1], [], []>} : vector<16x32xbf16>, vector<32x32xbf16>, vector<16x32xf32> -> vector<16x32xf32>
    %8 = arith.addf %3, %7 : vector<16x32xf32>
    %c0_6 = arith.constant 0 : index
    %c0_7 = arith.constant 0 : index
    %9 = vector.load %arg7[%c0_6, %c0_7] : memref<16x32xf32, #tpu.memory_space<vmem>>, vector<16x32xf32>
    tpu.vector_store %arg7[%c0_6, %c0_7], %8 {strides = array<i32>} : memref<16x32xf32, #tpu.memory_space<vmem>>, vector<16x32xf32>,
    %c0_i32_8 = arith.constant 0 : i32
    %10 = arith.cmpi eq, %arg2, %c0_i32_8 : i32
    %11 = arith.extui %10 : i1 to i32
    %c0_i32_9 = arith.constant 0 : i32
    %12 = arith.cmpi ne, %11, %c0_i32_9 : i32
    scf.if %12 {
      %c0_10 = arith.constant 0 : index
      %c0_11 = arith.constant 0 : index
      %13 = vector.load %arg7[%c0_10, %c0_11] : memref<16x32xf32, #tpu.memory_space<vmem>>, vector<16x32xf32>
      %c0_12 = arith.constant 0 : index
      %c0_13 = arith.constant 0 : index
      %14 = vector.load %arg5[%c0_12, %c0_13] : memref<1x32xf32, #tpu.memory_space<vmem>>, vector<1x32xf32>
      %15 = vector.broadcast %14 : vector<1x32xf32> to vector<16x32xf32>
      %16 = arith.addf %13, %15 : vector<16x32xf32>
      %17 = arith.truncf %16 : vector<16x32xf32> to vector<16x32xbf16>
      %c0_14 = arith.constant 0 : index
      %c0_15 = arith.constant 0 : index
      %18 = vector.load %arg6[%c0_14, %c0_15] : memref<16x32xbf16, #tpu.memory_space<vmem>>, vector<16x32xbf16>
      tpu.vector_store %arg6[%c0_14, %c0_15], %17 {strides = array<i32>} : memref<16x32xbf16, #tpu.memory_space<vmem>>, vector<16x32xbf16>,
    } else {
    }
    return
  }
  func.func @transform_0(%arg0: i32, %arg1: i32, %arg2: i32) -> (i32, i32) {
    %c0_i32 = arith.constant 0 : i32
    return %arg0, %arg2 : i32, i32
  }
  func.func @transform_1(%arg0: i32, %arg1: i32, %arg2: i32) -> (i32, i32) {
    %c0_i32 = arith.constant 0 : i32
    return %arg2, %arg1 : i32, i32
  }
  func.func @transform_2(%arg0: i32, %arg1: i32, %arg2: i32) -> (i32, i32) {
    %c0_i32 = arith.constant 0 : i32
    %c0_i32_0 = arith.constant 0 : i32
    return %c0_i32, %arg1 : i32, i32
  }
  func.func @transform_3(%arg0: i32, %arg1: i32, %arg2: i32) -> (i32, i32) {
    %c0_i32 = arith.constant 0 : i32
    return %arg0, %arg1 : i32, i32
  }
}

module attributes {stable_mosaic.version = 11 : i64} {
  func.func @_flash_kernel(%arg0: i32, %arg1: i32, %arg2: i32, %arg3: memref<1x8x8xbf16, #tpu.memory_space<vmem>>, %arg4: memref<1x8x8xbf16, #tpu.memory_space<vmem>>, %arg5: memref<1x8x8xbf16, #tpu.memory_space<vmem>>, %arg6: memref<1x8x8xbf16, #tpu.memory_space<vmem>>, %arg7: memref<8x1xf32, #tpu.memory_space<vmem>>, %arg8: memref<8x1xf32, #tpu.memory_space<vmem>>, %arg9: memref<8x8xf32, #tpu.memory_space<vmem>>) attributes {dimension_semantics = [#tpu.dimension_semantics<parallel>, #tpu.dimension_semantics<parallel>, #tpu.dimension_semantics<arbitrary>], iteration_bounds = array<i64: 8, 1, 1>, scalar_prefetch = 0 : i64, scratch_operands = 3 : i64, tpu.core_type = #tpu.core_type<tc>, window_params = [{transform_indices = @transform_0, window_bounds = array<i64: 1, 8, 8>}, {transform_indices = @transform_1, window_bounds = array<i64: 1, 8, 8>}, {transform_indices = @transform_2, window_bounds = array<i64: 1, 8, 8>}, {transform_indices = @transform_3, window_bounds = array<i64: 1, 8, 8>}]} {
    %c0_i32 = arith.constant 0 : i32
    %0 = arith.cmpi eq, %arg2, %c0_i32 : i32
    %1 = arith.extui %0 : i1 to i32
    %c0_i32_0 = arith.constant 0 : i32
    %2 = arith.cmpi ne, %1, %c0_i32_0 : i32
    scf.if %2 {
      %cst = arith.constant -1.000000e+30 : f32
      %12 = vector.broadcast %cst : f32 to vector<8x1xf32>
      %c0 = arith.constant 0 : index
      %c0_5 = arith.constant 0 : index
      %13 = vector.load %arg7[%c0, %c0_5] : memref<8x1xf32, #tpu.memory_space<vmem>>, vector<8x1xf32>
      tpu.vector_store %arg7[%c0, %c0_5], %12 {strides = array<i32>} : memref<8x1xf32, #tpu.memory_space<vmem>>, vector<8x1xf32>,
      %cst_6 = arith.constant 0.000000e+00 : f32
      %14 = vector.broadcast %cst_6 : f32 to vector<8x1xf32>
      %c0_7 = arith.constant 0 : index
      %c0_8 = arith.constant 0 : index
      %15 = vector.load %arg8[%c0_7, %c0_8] : memref<8x1xf32, #tpu.memory_space<vmem>>, vector<8x1xf32>
      tpu.vector_store %arg8[%c0_7, %c0_8], %14 {strides = array<i32>} : memref<8x1xf32, #tpu.memory_space<vmem>>, vector<8x1xf32>,
      %cst_9 = arith.constant 0.000000e+00 : f32
      %16 = vector.broadcast %cst_9 : f32 to vector<8x8xf32>
      %c0_10 = arith.constant 0 : index
      %c0_11 = arith.constant 0 : index
      %17 = vector.load %arg9[%c0_10, %c0_11] : memref<8x8xf32, #tpu.memory_space<vmem>>, vector<8x8xf32>
      tpu.vector_store %arg9[%c0_10, %c0_11], %16 {strides = array<i32>} : memref<8x8xf32, #tpu.memory_space<vmem>>, vector<8x8xf32>,
    } else {
    }
    %c8_i32 = arith.constant 8 : i32
    %3 = arith.muli %arg2, %c8_i32 : i32
    %c8_i32_1 = arith.constant 8 : i32
    %4 = arith.muli %arg1, %c8_i32_1 : i32
    %c7_i32 = arith.constant 7 : i32
    %5 = arith.addi %4, %c7_i32 : i32
    %6 = arith.cmpi sle, %3, %5 : i32
    %7 = arith.extui %6 : i1 to i32
    %c0_i32_2 = arith.constant 0 : i32
    %8 = arith.cmpi ne, %7, %c0_i32_2 : i32
    scf.if %8 {
      %c0 = arith.constant 0 : index
      %c0_5 = arith.constant 0 : index
      %c0_6 = arith.constant 0 : index
      %12 = vector.load %arg3[%c0, %c0_5, %c0_6] : memref<1x8x8xbf16, #tpu.memory_space<vmem>>, vector<1x8x8xbf16>
      %13 = vector.shape_cast %12 : vector<1x8x8xbf16> to vector<8x8xbf16>
      %14 = arith.extf %13 : vector<8x8xbf16> to vector<8x8xf32>
      %cst = arith.constant 0.353553385 : f32
      %15 = vector.broadcast %cst : f32 to vector<8x8xf32>
      %16 = arith.mulf %14, %15 : vector<8x8xf32>
      %17 = arith.truncf %16 : vector<8x8xf32> to vector<8x8xbf16>
      %c0_7 = arith.constant 0 : index
      %c0_8 = arith.constant 0 : index
      %c0_9 = arith.constant 0 : index
      %18 = vector.load %arg4[%c0_7, %c0_8, %c0_9] : memref<1x8x8xbf16, #tpu.memory_space<vmem>>, vector<1x8x8xbf16>
      %19 = vector.shape_cast %18 : vector<1x8x8xbf16> to vector<8x8xbf16>
      %c0_10 = arith.constant 0 : index
      %c0_11 = arith.constant 0 : index
      %c0_12 = arith.constant 0 : index
      %20 = vector.load %arg5[%c0_10, %c0_11, %c0_12] : memref<1x8x8xbf16, #tpu.memory_space<vmem>>, vector<1x8x8xbf16>
      %21 = vector.shape_cast %20 : vector<1x8x8xbf16> to vector<8x8xbf16>
      %cst_13 = arith.constant dense<0.000000e+00> : vector<8x8xf32>
      %22 = tpu.matmul %17, %19, %cst_13 {dimension_numbers = #tpu.dot_dimension_numbers<[1], [1], [0], [0], [0, 0, 1, 0], [], []>} : vector<8x8xbf16>, vector<8x8xbf16>, vector<8x8xf32> -> vector<8x8xf32>
      %c8_i32_14 = arith.constant 8 : i32
      %23 = arith.muli %arg1, %c8_i32_14 : i32
      %24 = tpu.iota {dimensions = array<i32: 0>} : vector<8x8xi32>
      %25 = vector.broadcast %23 : i32 to vector<8x8xi32>
      %26 = arith.addi %25, %24 : vector<8x8xi32>
      %c8_i32_15 = arith.constant 8 : i32
      %27 = arith.muli %arg2, %c8_i32_15 : i32
      %28 = tpu.iota {dimensions = array<i32: 1>} : vector<8x8xi32>
      %29 = vector.broadcast %27 : i32 to vector<8x8xi32>
      %30 = arith.addi %29, %28 : vector<8x8xi32>
      %31 = arith.cmpi sle, %30, %26 : vector<8x8xi32>
      %cst_16 = arith.constant -1.000000e+30 : f32
      %32 = vector.broadcast %cst_16 : f32 to vector<8x8xf32>
      %33 = arith.select %31, %22, %32 : vector<8x8xi1>, vector<8x8xf32>
      %c0_17 = arith.constant 0 : index
      %c0_18 = arith.constant 0 : index
      %34 = vector.load %arg7[%c0_17, %c0_18] : memref<8x1xf32, #tpu.memory_space<vmem>>, vector<8x1xf32>
      %cst_19 = arith.constant dense<0xFF800000> : vector<8xf32>
      %35 = vector.multi_reduction <maximumf>, %33, %cst_19 [1] : vector<8x8xf32> to vector<8xf32>
      %36 = vector.shape_cast %35 : vector<8xf32> to vector<8x1xf32>
      %37 = arith.maximumf %34, %36 : vector<8x1xf32>
      %38 = arith.subf %34, %37 : vector<8x1xf32>
      %39 = math.exp %38 : vector<8x1xf32>
      %40 = vector.broadcast %37 : vector<8x1xf32> to vector<8x8xf32>
      %41 = arith.subf %33, %40 : vector<8x8xf32>
      %42 = math.exp %41 : vector<8x8xf32>
      %c0_20 = arith.constant 0 : index
      %c0_21 = arith.constant 0 : index
      %43 = vector.load %arg8[%c0_20, %c0_21] : memref<8x1xf32, #tpu.memory_space<vmem>>, vector<8x1xf32>
      %44 = arith.mulf %39, %43 : vector<8x1xf32>
      %cst_22 = arith.constant dense<0.000000e+00> : vector<8xf32>
      %45 = vector.multi_reduction <add>, %42, %cst_22 [1] : vector<8x8xf32> to vector<8xf32>
      %46 = vector.shape_cast %45 : vector<8xf32> to vector<8x1xf32>
      %47 = arith.addf %44, %46 : vector<8x1xf32>
      %c0_23 = arith.constant 0 : index
      %c0_24 = arith.constant 0 : index
      %48 = vector.load %arg8[%c0_23, %c0_24] : memref<8x1xf32, #tpu.memory_space<vmem>>, vector<8x1xf32>
      tpu.vector_store %arg8[%c0_23, %c0_24], %47 {strides = array<i32>} : memref<8x1xf32, #tpu.memory_space<vmem>>, vector<8x1xf32>,
      %c0_25 = arith.constant 0 : index
      %c0_26 = arith.constant 0 : index
      %49 = vector.load %arg9[%c0_25, %c0_26] : memref<8x8xf32, #tpu.memory_space<vmem>>, vector<8x8xf32>
      %50 = vector.broadcast %39 : vector<8x1xf32> to vector<8x8xf32>
      %51 = arith.mulf %50, %49 : vector<8x8xf32>
      %52 = arith.truncf %42 : vector<8x8xf32> to vector<8x8xbf16>
      %cst_27 = arith.constant dense<0.000000e+00> : vector<8x8xf32>
      %53 = tpu.matmul %52, %21, %cst_27 {dimension_numbers = #tpu.dot_dimension_numbers<[1], [0], [0], [1], [0, 0, 1, 1], [], []>} : vector<8x8xbf16>, vector<8x8xbf16>, vector<8x8xf32> -> vector<8x8xf32>
      %54 = arith.addf %51, %53 : vector<8x8xf32>
      %c0_28 = arith.constant 0 : index
      %c0_29 = arith.constant 0 : index
      %55 = vector.load %arg9[%c0_28, %c0_29] : memref<8x8xf32, #tpu.memory_space<vmem>>, vector<8x8xf32>
      tpu.vector_store %arg9[%c0_28, %c0_29], %54 {strides = array<i32>} : memref<8x8xf32, #tpu.memory_space<vmem>>, vector<8x8xf32>,
      %c0_30 = arith.constant 0 : index
      %c0_31 = arith.constant 0 : index
      %56 = vector.load %arg7[%c0_30, %c0_31] : memref<8x1xf32, #tpu.memory_space<vmem>>, vector<8x1xf32>
      tpu.vector_store %arg7[%c0_30, %c0_31], %37 {strides = array<i32>} : memref<8x1xf32, #tpu.memory_space<vmem>>, vector<8x1xf32>,
    } else {
    }
    %c0_i32_3 = arith.constant 0 : i32
    %9 = arith.cmpi eq, %arg2, %c0_i32_3 : i32
    %10 = arith.extui %9 : i1 to i32
    %c0_i32_4 = arith.constant 0 : i32
    %11 = arith.cmpi ne, %10, %c0_i32_4 : i32
    scf.if %11 {
      %c0 = arith.constant 0 : index
      %c0_5 = arith.constant 0 : index
      %12 = vector.load %arg8[%c0, %c0_5] : memref<8x1xf32, #tpu.memory_space<vmem>>, vector<8x1xf32>
      %13 = tpu.reciprocal %12 {approx = true} : vector<8x1xf32> -> vector<8x1xf32>
      %c0_6 = arith.constant 0 : index
      %c0_7 = arith.constant 0 : index
      %14 = vector.load %arg9[%c0_6, %c0_7] : memref<8x8xf32, #tpu.memory_space<vmem>>, vector<8x8xf32>
      %15 = vector.broadcast %13 : vector<8x1xf32> to vector<8x8xf32>
      %16 = arith.mulf %14, %15 : vector<8x8xf32>
      %17 = arith.truncf %16 : vector<8x8xf32> to vector<8x8xbf16>
      %c0_8 = arith.constant 0 : index
      %c0_9 = arith.constant 0 : index
      %c0_10 = arith.constant 0 : index
      %18 = vector.load %arg6[%c0_8, %c0_9, %c0_10] : memref<1x8x8xbf16, #tpu.memory_space<vmem>>, vector<1x8x8xbf16>
      %19 = vector.shape_cast %18 : vector<1x8x8xbf16> to vector<8x8xbf16>
      %20 = vector.shape_cast %17 : vector<8x8xbf16> to vector<1x8x8xbf16>
      tpu.vector_store %arg6[%c0_8, %c0_9, %c0_10], %20 {strides = array<i32>} : memref<1x8x8xbf16, #tpu.memory_space<vmem>>, vector<1x8x8xbf16>,
    } else {
    }
    return
  }
  func.func @transform_0(%arg0: i32, %arg1: i32, %arg2: i32) -> (i32, i32, i32) {
    %c0_i32 = arith.constant 0 : i32
    %c0_i32_0 = arith.constant 0 : i32
    return %arg0, %arg1, %c0_i32 : i32, i32, i32
  }
  func.func @transform_1(%arg0: i32, %arg1: i32, %arg2: i32) -> (i32, i32, i32) {
    %c0_i32 = arith.constant 0 : i32
    %c0_i32_0 = arith.constant 0 : i32
    return %arg0, %arg2, %c0_i32 : i32, i32, i32
  }
  func.func @transform_2(%arg0: i32, %arg1: i32, %arg2: i32) -> (i32, i32, i32) {
    %c0_i32 = arith.constant 0 : i32
    %c0_i32_0 = arith.constant 0 : i32
    return %arg0, %arg2, %c0_i32 : i32, i32, i32
  }
  func.func @transform_3(%arg0: i32, %arg1: i32, %arg2: i32) -> (i32, i32, i32) {
    %c0_i32 = arith.constant 0 : i32
    %c0_i32_0 = arith.constant 0 : i32
    return %arg0, %arg1, %c0_i32 : i32, i32, i32
  }
}

module attributes {stable_mosaic.version = 11 : i64} {
  func.func @_matmul_resln_kernel(%arg0: i32, %arg1: i32, %arg2: memref<16x32xbf16, #tpu.memory_space<vmem>>, %arg3: memref<32x32xbf16, #tpu.memory_space<vmem>>, %arg4: memref<1x32xf32, #tpu.memory_space<vmem>>, %arg5: memref<16x32xf32, #tpu.memory_space<vmem>>, %arg6: memref<1x32xf32, #tpu.memory_space<vmem>>, %arg7: memref<1x32xf32, #tpu.memory_space<vmem>>, %arg8: memref<16x32xf32, #tpu.memory_space<vmem>>, %arg9: memref<16x32xf32, #tpu.memory_space<vmem>>) attributes {dimension_semantics = [#tpu.dimension_semantics<parallel>, #tpu.dimension_semantics<arbitrary>], iteration_bounds = array<i64: 1, 1>, scalar_prefetch = 0 : i64, scratch_operands = 1 : i64, tpu.core_type = #tpu.core_type<tc>, window_params = [{transform_indices = @transform_0, window_bounds = array<i64: 16, 32>}, {transform_indices = @transform_1, window_bounds = array<i64: 32, 32>}, {pipeline_mode = #tpu.pipeline_mode<synchronous>, transform_indices = @transform_2, window_bounds = array<i64: 1, 32>}, {transform_indices = @transform_3, window_bounds = array<i64: 16, 32>}, {pipeline_mode = #tpu.pipeline_mode<synchronous>, transform_indices = @transform_4, window_bounds = array<i64: 1, 32>}, {pipeline_mode = #tpu.pipeline_mode<synchronous>, transform_indices = @transform_5, window_bounds = array<i64: 1, 32>}, {transform_indices = @transform_6, window_bounds = array<i64: 16, 32>}]} {
    %c0_i32 = arith.constant 0 : i32
    %0 = arith.cmpi eq, %arg1, %c0_i32 : i32
    %1 = arith.extui %0 : i1 to i32
    %c0_i32_0 = arith.constant 0 : i32
    %2 = arith.cmpi ne, %1, %c0_i32_0 : i32
    scf.if %2 {
      %cst_10 = arith.constant 0.000000e+00 : f32
      %12 = vector.broadcast %cst_10 : f32 to vector<16x32xf32>
      %c0_11 = arith.constant 0 : index
      %c0_12 = arith.constant 0 : index
      %13 = vector.load %arg9[%c0_11, %c0_12] : memref<16x32xf32, #tpu.memory_space<vmem>>, vector<16x32xf32>
      tpu.vector_store %arg9[%c0_11, %c0_12], %12 {strides = array<i32>} : memref<16x32xf32, #tpu.memory_space<vmem>>, vector<16x32xf32>,
    } else {
    }
    %c0 = arith.constant 0 : index
    %c0_1 = arith.constant 0 : index
    %3 = vector.load %arg9[%c0, %c0_1] : memref<16x32xf32, #tpu.memory_space<vmem>>, vector<16x32xf32>
    %c0_2 = arith.constant 0 : index
    %c0_3 = arith.constant 0 : index
    %4 = vector.load %arg2[%c0_2, %c0_3] : memref<16x32xbf16, #tpu.memory_space<vmem>>, vector<16x32xbf16>
    %c0_4 = arith.constant 0 : index
    %c0_5 = arith.constant 0 : index
    %5 = vector.load %arg3[%c0_4, %c0_5] : memref<32x32xbf16, #tpu.memory_space<vmem>>, vector<32x32xbf16>
    %cst = arith.constant dense<0.000000e+00> : vector<16x32xf32>
    %6 = tpu.matmul %4, %5, %cst {dimension_numbers = #tpu.dot_dimension_numbers<[1], [0], [0], [1], [0, 0, 1, 1], [], []>} : vector<16x32xbf16>, vector<32x32xbf16>, vector<16x32xf32> -> vector<16x32xf32>
    %7 = arith.addf %3, %6 : vector<16x32xf32>
    %c0_6 = arith.constant 0 : index
    %c0_7 = arith.constant 0 : index
    %8 = vector.load %arg9[%c0_6, %c0_7] : memref<16x32xf32, #tpu.memory_space<vmem>>, vector<16x32xf32>
    tpu.vector_store %arg9[%c0_6, %c0_7], %7 {strides = array<i32>} : memref<16x32xf32, #tpu.memory_space<vmem>>, vector<16x32xf32>,
    %c0_i32_8 = arith.constant 0 : i32
    %9 = arith.cmpi eq, %arg1, %c0_i32_8 : i32
    %10 = arith.extui %9 : i1 to i32
    %c0_i32_9 = arith.constant 0 : i32
    %11 = arith.cmpi ne, %10, %c0_i32_9 : i32
    scf.if %11 {
      %c0_10 = arith.constant 0 : index
      %c0_11 = arith.constant 0 : index
      %12 = vector.load %arg9[%c0_10, %c0_11] : memref<16x32xf32, #tpu.memory_space<vmem>>, vector<16x32xf32>
      %c0_12 = arith.constant 0 : index
      %c0_13 = arith.constant 0 : index
      %13 = vector.load %arg4[%c0_12, %c0_13] : memref<1x32xf32, #tpu.memory_space<vmem>>, vector<1x32xf32>
      %14 = vector.broadcast %13 : vector<1x32xf32> to vector<16x32xf32>
      %15 = arith.addf %12, %14 : vector<16x32xf32>
      %c0_14 = arith.constant 0 : index
      %c0_15 = arith.constant 0 : index
      %16 = vector.load %arg5[%c0_14, %c0_15] : memref<16x32xf32, #tpu.memory_space<vmem>>, vector<16x32xf32>
      %17 = arith.addf %15, %16 : vector<16x32xf32>
      %cst_16 = arith.constant dense<0.000000e+00> : vector<16xf32>
      %18 = vector.multi_reduction <add>, %17, %cst_16 [1] : vector<16x32xf32> to vector<16xf32>
      %19 = vector.shape_cast %18 : vector<16xf32> to vector<16x1xf32>
      %cst_17 = arith.constant 3.200000e+01 : f32
      %20 = vector.broadcast %cst_17 : f32 to vector<16x1xf32>
      %21 = arith.divf %19, %20 : vector<16x1xf32>
      %22 = arith.mulf %17, %17 : vector<16x32xf32>
      %cst_18 = arith.constant dense<0.000000e+00> : vector<16xf32>
      %23 = vector.multi_reduction <add>, %22, %cst_18 [1] : vector<16x32xf32> to vector<16xf32>
      %24 = vector.shape_cast %23 : vector<16xf32> to vector<16x1xf32>
      %cst_19 = arith.constant 3.200000e+01 : f32
      %25 = vector.broadcast %cst_19 : f32 to vector<16x1xf32>
      %26 = arith.divf %24, %25 : vector<16x1xf32>
      %27 = arith.mulf %21, %21 : vector<16x1xf32>
      %28 = arith.subf %26, %27 : vector<16x1xf32>
      %cst_20 = arith.constant 0.000000e+00 : f32
      %29 = vector.broadcast %cst_20 : f32 to vector<16x1xf32>
      %30 = arith.maximumf %28, %29 : vector<16x1xf32>
      %31 = vector.broadcast %21 : vector<16x1xf32> to vector<16x32xf32>
      %32 = arith.subf %17, %31 : vector<16x32xf32>
      %cst_21 = arith.constant 9.99999974E-6 : f32
      %33 = vector.broadcast %cst_21 : f32 to vector<16x1xf32>
      %34 = arith.addf %30, %33 : vector<16x1xf32>
      %35 = math.rsqrt %34 : vector<16x1xf32>
      %36 = vector.broadcast %35 : vector<16x1xf32> to vector<16x32xf32>
      %37 = arith.mulf %32, %36 : vector<16x32xf32>
      %c0_22 = arith.constant 0 : index
      %c0_23 = arith.constant 0 : index
      %38 = vector.load %arg6[%c0_22, %c0_23] : memref<1x32xf32, #tpu.memory_space<vmem>>, vector<1x32xf32>
      %39 = vector.broadcast %38 : vector<1x32xf32> to vector<16x32xf32>
      %40 = arith.mulf %37, %39 : vector<16x32xf32>
      %c0_24 = arith.constant 0 : index
      %c0_25 = arith.constant 0 : index
      %41 = vector.load %arg7[%c0_24, %c0_25] : memref<1x32xf32, #tpu.memory_space<vmem>>, vector<1x32xf32>
      %42 = vector.broadcast %41 : vector<1x32xf32> to vector<16x32xf32>
      %43 = arith.addf %40, %42 : vector<16x32xf32>
      %c0_26 = arith.constant 0 : index
      %c0_27 = arith.constant 0 : index
      %44 = vector.load %arg8[%c0_26, %c0_27] : memref<16x32xf32, #tpu.memory_space<vmem>>, vector<16x32xf32>
      tpu.vector_store %arg8[%c0_26, %c0_27], %43 {strides = array<i32>} : memref<16x32xf32, #tpu.memory_space<vmem>>, vector<16x32xf32>,
    } else {
    }
    return
  }
  func.func @transform_0(%arg0: i32, %arg1: i32) -> (i32, i32) {
    %c0_i32 = arith.constant 0 : i32
    return %arg0, %arg1 : i32, i32
  }
  func.func @transform_1(%arg0: i32, %arg1: i32) -> (i32, i32) {
    %c0_i32 = arith.constant 0 : i32
    %c0_i32_0 = arith.constant 0 : i32
    return %arg1, %c0_i32 : i32, i32
  }
  func.func @transform_2(%arg0: i32, %arg1: i32) -> (i32, i32) {
    %c0_i32 = arith.constant 0 : i32
    %c0_i32_0 = arith.constant 0 : i32
    %c0_i32_1 = arith.constant 0 : i32
    return %c0_i32, %c0_i32_0 : i32, i32
  }
  func.func @transform_3(%arg0: i32, %arg1: i32) -> (i32, i32) {
    %c0_i32 = arith.constant 0 : i32
    %c0_i32_0 = arith.constant 0 : i32
    return %arg0, %c0_i32 : i32, i32
  }
  func.func @transform_4(%arg0: i32, %arg1: i32) -> (i32, i32) {
    %c0_i32 = arith.constant 0 : i32
    %c0_i32_0 = arith.constant 0 : i32
    %c0_i32_1 = arith.constant 0 : i32
    return %c0_i32, %c0_i32_0 : i32, i32
  }
  func.func @transform_5(%arg0: i32, %arg1: i32) -> (i32, i32) {
    %c0_i32 = arith.constant 0 : i32
    %c0_i32_0 = arith.constant 0 : i32
    %c0_i32_1 = arith.constant 0 : i32
    return %c0_i32, %c0_i32_0 : i32, i32
  }
  func.func @transform_6(%arg0: i32, %arg1: i32) -> (i32, i32) {
    %c0_i32 = arith.constant 0 : i32
    %c0_i32_0 = arith.constant 0 : i32
    return %arg0, %c0_i32 : i32, i32
  }
}

module attributes {stable_mosaic.version = 11 : i64} {
  func.func @_flash_kernel(%arg0: i32, %arg1: i32, %arg2: i32, %arg3: memref<1x8x8xbf16, #tpu.memory_space<vmem>>, %arg4: memref<1x8x8xbf16, #tpu.memory_space<vmem>>, %arg5: memref<1x8x8xbf16, #tpu.memory_space<vmem>>, %arg6: memref<1x8x8xbf16, #tpu.memory_space<vmem>>, %arg7: memref<8x1xf32, #tpu.memory_space<vmem>>, %arg8: memref<8x1xf32, #tpu.memory_space<vmem>>, %arg9: memref<8x8xf32, #tpu.memory_space<vmem>>) attributes {dimension_semantics = [#tpu.dimension_semantics<parallel>, #tpu.dimension_semantics<parallel>, #tpu.dimension_semantics<arbitrary>], iteration_bounds = array<i64: 8, 1, 1>, scalar_prefetch = 0 : i64, scratch_operands = 3 : i64, tpu.core_type = #tpu.core_type<tc>, window_params = [{transform_indices = @transform_0, window_bounds = array<i64: 1, 8, 8>}, {transform_indices = @transform_1, window_bounds = array<i64: 1, 8, 8>}, {transform_indices = @transform_2, window_bounds = array<i64: 1, 8, 8>}, {transform_indices = @transform_3, window_bounds = array<i64: 1, 8, 8>}]} {
    %c0_i32 = arith.constant 0 : i32
    %0 = arith.cmpi eq, %arg2, %c0_i32 : i32
    %1 = arith.extui %0 : i1 to i32
    %c0_i32_0 = arith.constant 0 : i32
    %2 = arith.cmpi ne, %1, %c0_i32_0 : i32
    scf.if %2 {
      %cst_27 = arith.constant -1.000000e+30 : f32
      %40 = vector.broadcast %cst_27 : f32 to vector<8x1xf32>
      %c0_28 = arith.constant 0 : index
      %c0_29 = arith.constant 0 : index
      %41 = vector.load %arg7[%c0_28, %c0_29] : memref<8x1xf32, #tpu.memory_space<vmem>>, vector<8x1xf32>
      tpu.vector_store %arg7[%c0_28, %c0_29], %40 {strides = array<i32>} : memref<8x1xf32, #tpu.memory_space<vmem>>, vector<8x1xf32>,
      %cst_30 = arith.constant 0.000000e+00 : f32
      %42 = vector.broadcast %cst_30 : f32 to vector<8x1xf32>
      %c0_31 = arith.constant 0 : index
      %c0_32 = arith.constant 0 : index
      %43 = vector.load %arg8[%c0_31, %c0_32] : memref<8x1xf32, #tpu.memory_space<vmem>>, vector<8x1xf32>
      tpu.vector_store %arg8[%c0_31, %c0_32], %42 {strides = array<i32>} : memref<8x1xf32, #tpu.memory_space<vmem>>, vector<8x1xf32>,
      %cst_33 = arith.constant 0.000000e+00 : f32
      %44 = vector.broadcast %cst_33 : f32 to vector<8x8xf32>
      %c0_34 = arith.constant 0 : index
      %c0_35 = arith.constant 0 : index
      %45 = vector.load %arg9[%c0_34, %c0_35] : memref<8x8xf32, #tpu.memory_space<vmem>>, vector<8x8xf32>
      tpu.vector_store %arg9[%c0_34, %c0_35], %44 {strides = array<i32>} : memref<8x8xf32, #tpu.memory_space<vmem>>, vector<8x8xf32>,
    } else {
    }
    %c0 = arith.constant 0 : index
    %c0_1 = arith.constant 0 : index
    %c0_2 = arith.constant 0 : index
    %3 = vector.load %arg3[%c0, %c0_1, %c0_2] : memref<1x8x8xbf16, #tpu.memory_space<vmem>>, vector<1x8x8xbf16>
    %4 = vector.shape_cast %3 : vector<1x8x8xbf16> to vector<8x8xbf16>
    %5 = arith.extf %4 : vector<8x8xbf16> to vector<8x8xf32>
    %cst = arith.constant 0.353553385 : f32
    %6 = vector.broadcast %cst : f32 to vector<8x8xf32>
    %7 = arith.mulf %5, %6 : vector<8x8xf32>
    %8 = arith.truncf %7 : vector<8x8xf32> to vector<8x8xbf16>
    %c0_3 = arith.constant 0 : index
    %c0_4 = arith.constant 0 : index
    %c0_5 = arith.constant 0 : index
    %9 = vector.load %arg4[%c0_3, %c0_4, %c0_5] : memref<1x8x8xbf16, #tpu.memory_space<vmem>>, vector<1x8x8xbf16>
    %10 = vector.shape_cast %9 : vector<1x8x8xbf16> to vector<8x8xbf16>
    %c0_6 = arith.constant 0 : index
    %c0_7 = arith.constant 0 : index
    %c0_8 = arith.constant 0 : index
    %11 = vector.load %arg5[%c0_6, %c0_7, %c0_8] : memref<1x8x8xbf16, #tpu.memory_space<vmem>>, vector<1x8x8xbf16>
    %12 = vector.shape_cast %11 : vector<1x8x8xbf16> to vector<8x8xbf16>
    %cst_9 = arith.constant dense<0.000000e+00> : vector<8x8xf32>
    %13 = tpu.matmul %8, %10, %cst_9 {dimension_numbers = #tpu.dot_dimension_numbers<[1], [1], [0], [0], [0, 0, 1, 0], [], []>} : vector<8x8xbf16>, vector<8x8xbf16>, vector<8x8xf32> -> vector<8x8xf32>
    %c0_10 = arith.constant 0 : index
    %c0_11 = arith.constant 0 : index
    %14 = vector.load %arg7[%c0_10, %c0_11] : memref<8x1xf32, #tpu.memory_space<vmem>>, vector<8x1xf32>
    %cst_12 = arith.constant dense<0xFF800000> : vector<8xf32>
    %15 = vector.multi_reduction <maximumf>, %13, %cst_12 [1] : vector<8x8xf32> to vector<8xf32>
    %16 = vector.shape_cast %15 : vector<8xf32> to vector<8x1xf32>
    %17 = arith.maximumf %14, %16 : vector<8x1xf32>
    %18 = arith.subf %14, %17 : vector<8x1xf32>
    %19 = math.exp %18 : vector<8x1xf32>
    %20 = vector.broadcast %17 : vector<8x1xf32> to vector<8x8xf32>
    %21 = arith.subf %13, %20 : vector<8x8xf32>
    %22 = math.exp %21 : vector<8x8xf32>
    %c0_13 = arith.constant 0 : index
    %c0_14 = arith.constant 0 : index
    %23 = vector.load %arg8[%c0_13, %c0_14] : memref<8x1xf32, #tpu.memory_space<vmem>>, vector<8x1xf32>
    %24 = arith.mulf %19, %23 : vector<8x1xf32>
    %cst_15 = arith.constant dense<0.000000e+00> : vector<8xf32>
    %25 = vector.multi_reduction <add>, %22, %cst_15 [1] : vector<8x8xf32> to vector<8xf32>
    %26 = vector.shape_cast %25 : vector<8xf32> to vector<8x1xf32>
    %27 = arith.addf %24, %26 : vector<8x1xf32>
    %c0_16 = arith.constant 0 : index
    %c0_17 = arith.constant 0 : index
    %28 = vector.load %arg8[%c0_16, %c0_17] : memref<8x1xf32, #tpu.memory_space<vmem>>, vector<8x1xf32>
    tpu.vector_store %arg8[%c0_16, %c0_17], %27 {strides = array<i32>} : memref<8x1xf32, #tpu.memory_space<vmem>>, vector<8x1xf32>,
    %c0_18 = arith.constant 0 : index
    %c0_19 = arith.constant 0 : index
    %29 = vector.load %arg9[%c0_18, %c0_19] : memref<8x8xf32, #tpu.memory_space<vmem>>, vector<8x8xf32>
    %30 = vector.broadcast %19 : vector<8x1xf32> to vector<8x8xf32>
    %31 = arith.mulf %30, %29 : vector<8x8xf32>
    %32 = arith.truncf %22 : vector<8x8xf32> to vector<8x8xbf16>
    %cst_20 = arith.constant dense<0.000000e+00> : vector<8x8xf32>
    %33 = tpu.matmul %32, %12, %cst_20 {dimension_numbers = #tpu.dot_dimension_numbers<[1], [0], [0], [1], [0, 0, 1, 1], [], []>} : vector<8x8xbf16>, vector<8x8xbf16>, vector<8x8xf32> -> vector<8x8xf32>
    %34 = arith.addf %31, %33 : vector<8x8xf32>
    %c0_21 = arith.constant 0 : index
    %c0_22 = arith.constant 0 : index
    %35 = vector.load %arg9[%c0_21, %c0_22] : memref<8x8xf32, #tpu.memory_space<vmem>>, vector<8x8xf32>
    tpu.vector_store %arg9[%c0_21, %c0_22], %34 {strides = array<i32>} : memref<8x8xf32, #tpu.memory_space<vmem>>, vector<8x8xf32>,
    %c0_23 = arith.constant 0 : index
    %c0_24 = arith.constant 0 : index
    %36 = vector.load %arg7[%c0_23, %c0_24] : memref<8x1xf32, #tpu.memory_space<vmem>>, vector<8x1xf32>
    tpu.vector_store %arg7[%c0_23, %c0_24], %17 {strides = array<i32>} : memref<8x1xf32, #tpu.memory_space<vmem>>, vector<8x1xf32>,
    %c0_i32_25 = arith.constant 0 : i32
    %37 = arith.cmpi eq, %arg2, %c0_i32_25 : i32
    %38 = arith.extui %37 : i1 to i32
    %c0_i32_26 = arith.constant 0 : i32
    %39 = arith.cmpi ne, %38, %c0_i32_26 : i32
    scf.if %39 {
      %c0_27 = arith.constant 0 : index
      %c0_28 = arith.constant 0 : index
      %40 = vector.load %arg8[%c0_27, %c0_28] : memref<8x1xf32, #tpu.memory_space<vmem>>, vector<8x1xf32>
      %41 = tpu.reciprocal %40 {approx = true} : vector<8x1xf32> -> vector<8x1xf32>
      %c0_29 = arith.constant 0 : index
      %c0_30 = arith.constant 0 : index
      %42 = vector.load %arg9[%c0_29, %c0_30] : memref<8x8xf32, #tpu.memory_space<vmem>>, vector<8x8xf32>
      %43 = vector.broadcast %41 : vector<8x1xf32> to vector<8x8xf32>
      %44 = arith.mulf %42, %43 : vector<8x8xf32>
      %45 = arith.truncf %44 : vector<8x8xf32> to vector<8x8xbf16>
      %c0_31 = arith.constant 0 : index
      %c0_32 = arith.constant 0 : index
      %c0_33 = arith.constant 0 : index
      %46 = vector.load %arg6[%c0_31, %c0_32, %c0_33] : memref<1x8x8xbf16, #tpu.memory_space<vmem>>, vector<1x8x8xbf16>
      %47 = vector.shape_cast %46 : vector<1x8x8xbf16> to vector<8x8xbf16>
      %48 = vector.shape_cast %45 : vector<8x8xbf16> to vector<1x8x8xbf16>
      tpu.vector_store %arg6[%c0_31, %c0_32, %c0_33], %48 {strides = array<i32>} : memref<1x8x8xbf16, #tpu.memory_space<vmem>>, vector<1x8x8xbf16>,
    } else {
    }
    return
  }
  func.func @transform_0(%arg0: i32, %arg1: i32, %arg2: i32) -> (i32, i32, i32) {
    %c0_i32 = arith.constant 0 : i32
    %c0_i32_0 = arith.constant 0 : i32
    return %arg0, %arg1, %c0_i32 : i32, i32, i32
  }
  func.func @transform_1(%arg0: i32, %arg1: i32, %arg2: i32) -> (i32, i32, i32) {
    %c0_i32 = arith.constant 0 : i32
    %c0_i32_0 = arith.constant 0 : i32
    return %arg0, %arg2, %c0_i32 : i32, i32, i32
  }
  func.func @transform_2(%arg0: i32, %arg1: i32, %arg2: i32) -> (i32, i32, i32) {
    %c0_i32 = arith.constant 0 : i32
    %c0_i32_0 = arith.constant 0 : i32
    return %arg0, %arg2, %c0_i32 : i32, i32, i32
  }
  func.func @transform_3(%arg0: i32, %arg1: i32, %arg2: i32) -> (i32, i32, i32) {
    %c0_i32 = arith.constant 0 : i32
    %c0_i32_0 = arith.constant 0 : i32
    return %arg0, %arg1, %c0_i32 : i32, i32, i32
  }
}

module attributes {stable_mosaic.version = 11 : i64} {
  func.func @_matmul_kernel(%arg0: i32, %arg1: i32, %arg2: i32, %arg3: memref<16x32xf32, #tpu.memory_space<vmem>>, %arg4: memref<32x128xbf16, #tpu.memory_space<vmem>>, %arg5: memref<1x128xf32, #tpu.memory_space<vmem>>, %arg6: memref<16x128xbf16, #tpu.memory_space<vmem>>, %arg7: memref<16x128xf32, #tpu.memory_space<vmem>>) attributes {dimension_semantics = [#tpu.dimension_semantics<parallel>, #tpu.dimension_semantics<parallel>, #tpu.dimension_semantics<arbitrary>], iteration_bounds = array<i64: 1, 1, 1>, scalar_prefetch = 0 : i64, scratch_operands = 1 : i64, tpu.core_type = #tpu.core_type<tc>, window_params = [{transform_indices = @transform_0, window_bounds = array<i64: 16, 32>}, {transform_indices = @transform_1, window_bounds = array<i64: 32, 128>}, {transform_indices = @transform_2, window_bounds = array<i64: 1, 128>}, {transform_indices = @transform_3, window_bounds = array<i64: 16, 128>}]} {
    %c0_i32 = arith.constant 0 : i32
    %0 = arith.cmpi eq, %arg2, %c0_i32 : i32
    %1 = arith.extui %0 : i1 to i32
    %c0_i32_0 = arith.constant 0 : i32
    %2 = arith.cmpi ne, %1, %c0_i32_0 : i32
    scf.if %2 {
      %cst_10 = arith.constant 0.000000e+00 : f32
      %13 = vector.broadcast %cst_10 : f32 to vector<16x128xf32>
      %c0_11 = arith.constant 0 : index
      %c0_12 = arith.constant 0 : index
      %14 = vector.load %arg7[%c0_11, %c0_12] : memref<16x128xf32, #tpu.memory_space<vmem>>, vector<16x128xf32>
      tpu.vector_store %arg7[%c0_11, %c0_12], %13 {strides = array<i32>} : memref<16x128xf32, #tpu.memory_space<vmem>>, vector<16x128xf32>,
    } else {
    }
    %c0 = arith.constant 0 : index
    %c0_1 = arith.constant 0 : index
    %3 = vector.load %arg7[%c0, %c0_1] : memref<16x128xf32, #tpu.memory_space<vmem>>, vector<16x128xf32>
    %c0_2 = arith.constant 0 : index
    %c0_3 = arith.constant 0 : index
    %4 = vector.load %arg3[%c0_2, %c0_3] : memref<16x32xf32, #tpu.memory_space<vmem>>, vector<16x32xf32>
    %5 = arith.truncf %4 : vector<16x32xf32> to vector<16x32xbf16>
    %c0_4 = arith.constant 0 : index
    %c0_5 = arith.constant 0 : index
    %6 = vector.load %arg4[%c0_4, %c0_5] : memref<32x128xbf16, #tpu.memory_space<vmem>>, vector<32x128xbf16>
    %cst = arith.constant dense<0.000000e+00> : vector<16x128xf32>
    %7 = tpu.matmul %5, %6, %cst {dimension_numbers = #tpu.dot_dimension_numbers<[1], [0], [0], [1], [0, 0, 1, 1], [], []>} : vector<16x32xbf16>, vector<32x128xbf16>, vector<16x128xf32> -> vector<16x128xf32>
    %8 = arith.addf %3, %7 : vector<16x128xf32>
    %c0_6 = arith.constant 0 : index
    %c0_7 = arith.constant 0 : index
    %9 = vector.load %arg7[%c0_6, %c0_7] : memref<16x128xf32, #tpu.memory_space<vmem>>, vector<16x128xf32>
    tpu.vector_store %arg7[%c0_6, %c0_7], %8 {strides = array<i32>} : memref<16x128xf32, #tpu.memory_space<vmem>>, vector<16x128xf32>,
    %c0_i32_8 = arith.constant 0 : i32
    %10 = arith.cmpi eq, %arg2, %c0_i32_8 : i32
    %11 = arith.extui %10 : i1 to i32
    %c0_i32_9 = arith.constant 0 : i32
    %12 = arith.cmpi ne, %11, %c0_i32_9 : i32
    scf.if %12 {
      %c0_10 = arith.constant 0 : index
      %c0_11 = arith.constant 0 : index
      %13 = vector.load %arg7[%c0_10, %c0_11] : memref<16x128xf32, #tpu.memory_space<vmem>>, vector<16x128xf32>
      %c0_12 = arith.constant 0 : index
      %c0_13 = arith.constant 0 : index
      %14 = vector.load %arg5[%c0_12, %c0_13] : memref<1x128xf32, #tpu.memory_space<vmem>>, vector<1x128xf32>
      %15 = vector.broadcast %14 : vector<1x128xf32> to vector<16x128xf32>
      %16 = arith.addf %13, %15 : vector<16x128xf32>
      %cst_14 = arith.constant 0.000000e+00 : f32
      %17 = vector.broadcast %cst_14 : f32 to vector<16x128xf32>
      %18 = arith.maximumf %16, %17 : vector<16x128xf32>
      %19 = arith.truncf %18 : vector<16x128xf32> to vector<16x128xbf16>
      %c0_15 = arith.constant 0 : index
      %c0_16 = arith.constant 0 : index
      %20 = vector.load %arg6[%c0_15, %c0_16] : memref<16x128xbf16, #tpu.memory_space<vmem>>, vector<16x128xbf16>
      tpu.vector_store %arg6[%c0_15, %c0_16], %19 {strides = array<i32>} : memref<16x128xbf16, #tpu.memory_space<vmem>>, vector<16x128xbf16>,
    } else {
    }
    return
  }
  func.func @transform_0(%arg0: i32, %arg1: i32, %arg2: i32) -> (i32, i32) {
    %c0_i32 = arith.constant 0 : i32
    return %arg0, %arg2 : i32, i32
  }
  func.func @transform_1(%arg0: i32, %arg1: i32, %arg2: i32) -> (i32, i32) {
    %c0_i32 = arith.constant 0 : i32
    return %arg2, %arg1 : i32, i32
  }
  func.func @transform_2(%arg0: i32, %arg1: i32, %arg2: i32) -> (i32, i32) {
    %c0_i32 = arith.constant 0 : i32
    %c0_i32_0 = arith.constant 0 : i32
    return %c0_i32, %arg1 : i32, i32
  }
  func.func @transform_3(%arg0: i32, %arg1: i32, %arg2: i32) -> (i32, i32) {
    %c0_i32 = arith.constant 0 : i32
    return %arg0, %arg1 : i32, i32
  }
}

module attributes {stable_mosaic.version = 11 : i64} {
  func.func @_matmul_resln_kernel(%arg0: i32, %arg1: i32, %arg2: memref<16x128xbf16, #tpu.memory_space<vmem>>, %arg3: memref<128x32xbf16, #tpu.memory_space<vmem>>, %arg4: memref<1x32xf32, #tpu.memory_space<vmem>>, %arg5: memref<16x32xf32, #tpu.memory_space<vmem>>, %arg6: memref<1x32xf32, #tpu.memory_space<vmem>>, %arg7: memref<1x32xf32, #tpu.memory_space<vmem>>, %arg8: memref<16x32xf32, #tpu.memory_space<vmem>>, %arg9: memref<16x32xf32, #tpu.memory_space<vmem>>) attributes {dimension_semantics = [#tpu.dimension_semantics<parallel>, #tpu.dimension_semantics<arbitrary>], iteration_bounds = array<i64: 1, 1>, scalar_prefetch = 0 : i64, scratch_operands = 1 : i64, tpu.core_type = #tpu.core_type<tc>, window_params = [{transform_indices = @transform_0, window_bounds = array<i64: 16, 128>}, {transform_indices = @transform_1, window_bounds = array<i64: 128, 32>}, {pipeline_mode = #tpu.pipeline_mode<synchronous>, transform_indices = @transform_2, window_bounds = array<i64: 1, 32>}, {transform_indices = @transform_3, window_bounds = array<i64: 16, 32>}, {pipeline_mode = #tpu.pipeline_mode<synchronous>, transform_indices = @transform_4, window_bounds = array<i64: 1, 32>}, {pipeline_mode = #tpu.pipeline_mode<synchronous>, transform_indices = @transform_5, window_bounds = array<i64: 1, 32>}, {transform_indices = @transform_6, window_bounds = array<i64: 16, 32>}]} {
    %c0_i32 = arith.constant 0 : i32
    %0 = arith.cmpi eq, %arg1, %c0_i32 : i32
    %1 = arith.extui %0 : i1 to i32
    %c0_i32_0 = arith.constant 0 : i32
    %2 = arith.cmpi ne, %1, %c0_i32_0 : i32
    scf.if %2 {
      %cst_10 = arith.constant 0.000000e+00 : f32
      %12 = vector.broadcast %cst_10 : f32 to vector<16x32xf32>
      %c0_11 = arith.constant 0 : index
      %c0_12 = arith.constant 0 : index
      %13 = vector.load %arg9[%c0_11, %c0_12] : memref<16x32xf32, #tpu.memory_space<vmem>>, vector<16x32xf32>
      tpu.vector_store %arg9[%c0_11, %c0_12], %12 {strides = array<i32>} : memref<16x32xf32, #tpu.memory_space<vmem>>, vector<16x32xf32>,
    } else {
    }
    %c0 = arith.constant 0 : index
    %c0_1 = arith.constant 0 : index
    %3 = vector.load %arg9[%c0, %c0_1] : memref<16x32xf32, #tpu.memory_space<vmem>>, vector<16x32xf32>
    %c0_2 = arith.constant 0 : index
    %c0_3 = arith.constant 0 : index
    %4 = vector.load %arg2[%c0_2, %c0_3] : memref<16x128xbf16, #tpu.memory_space<vmem>>, vector<16x128xbf16>
    %c0_4 = arith.constant 0 : index
    %c0_5 = arith.constant 0 : index
    %5 = vector.load %arg3[%c0_4, %c0_5] : memref<128x32xbf16, #tpu.memory_space<vmem>>, vector<128x32xbf16>
    %cst = arith.constant dense<0.000000e+00> : vector<16x32xf32>
    %6 = tpu.matmul %4, %5, %cst {dimension_numbers = #tpu.dot_dimension_numbers<[1], [0], [0], [1], [0, 0, 1, 1], [], []>} : vector<16x128xbf16>, vector<128x32xbf16>, vector<16x32xf32> -> vector<16x32xf32>
    %7 = arith.addf %3, %6 : vector<16x32xf32>
    %c0_6 = arith.constant 0 : index
    %c0_7 = arith.constant 0 : index
    %8 = vector.load %arg9[%c0_6, %c0_7] : memref<16x32xf32, #tpu.memory_space<vmem>>, vector<16x32xf32>
    tpu.vector_store %arg9[%c0_6, %c0_7], %7 {strides = array<i32>} : memref<16x32xf32, #tpu.memory_space<vmem>>, vector<16x32xf32>,
    %c0_i32_8 = arith.constant 0 : i32
    %9 = arith.cmpi eq, %arg1, %c0_i32_8 : i32
    %10 = arith.extui %9 : i1 to i32
    %c0_i32_9 = arith.constant 0 : i32
    %11 = arith.cmpi ne, %10, %c0_i32_9 : i32
    scf.if %11 {
      %c0_10 = arith.constant 0 : index
      %c0_11 = arith.constant 0 : index
      %12 = vector.load %arg9[%c0_10, %c0_11] : memref<16x32xf32, #tpu.memory_space<vmem>>, vector<16x32xf32>
      %c0_12 = arith.constant 0 : index
      %c0_13 = arith.constant 0 : index
      %13 = vector.load %arg4[%c0_12, %c0_13] : memref<1x32xf32, #tpu.memory_space<vmem>>, vector<1x32xf32>
      %14 = vector.broadcast %13 : vector<1x32xf32> to vector<16x32xf32>
      %15 = arith.addf %12, %14 : vector<16x32xf32>
      %c0_14 = arith.constant 0 : index
      %c0_15 = arith.constant 0 : index
      %16 = vector.load %arg5[%c0_14, %c0_15] : memref<16x32xf32, #tpu.memory_space<vmem>>, vector<16x32xf32>
      %17 = arith.addf %15, %16 : vector<16x32xf32>
      %cst_16 = arith.constant dense<0.000000e+00> : vector<16xf32>
      %18 = vector.multi_reduction <add>, %17, %cst_16 [1] : vector<16x32xf32> to vector<16xf32>
      %19 = vector.shape_cast %18 : vector<16xf32> to vector<16x1xf32>
      %cst_17 = arith.constant 3.200000e+01 : f32
      %20 = vector.broadcast %cst_17 : f32 to vector<16x1xf32>
      %21 = arith.divf %19, %20 : vector<16x1xf32>
      %22 = arith.mulf %17, %17 : vector<16x32xf32>
      %cst_18 = arith.constant dense<0.000000e+00> : vector<16xf32>
      %23 = vector.multi_reduction <add>, %22, %cst_18 [1] : vector<16x32xf32> to vector<16xf32>
      %24 = vector.shape_cast %23 : vector<16xf32> to vector<16x1xf32>
      %cst_19 = arith.constant 3.200000e+01 : f32
      %25 = vector.broadcast %cst_19 : f32 to vector<16x1xf32>
      %26 = arith.divf %24, %25 : vector<16x1xf32>
      %27 = arith.mulf %21, %21 : vector<16x1xf32>
      %28 = arith.subf %26, %27 : vector<16x1xf32>
      %cst_20 = arith.constant 0.000000e+00 : f32
      %29 = vector.broadcast %cst_20 : f32 to vector<16x1xf32>
      %30 = arith.maximumf %28, %29 : vector<16x1xf32>
      %31 = vector.broadcast %21 : vector<16x1xf32> to vector<16x32xf32>
      %32 = arith.subf %17, %31 : vector<16x32xf32>
      %cst_21 = arith.constant 9.99999974E-6 : f32
      %33 = vector.broadcast %cst_21 : f32 to vector<16x1xf32>
      %34 = arith.addf %30, %33 : vector<16x1xf32>
      %35 = math.rsqrt %34 : vector<16x1xf32>
      %36 = vector.broadcast %35 : vector<16x1xf32> to vector<16x32xf32>
      %37 = arith.mulf %32, %36 : vector<16x32xf32>
      %c0_22 = arith.constant 0 : index
      %c0_23 = arith.constant 0 : index
      %38 = vector.load %arg6[%c0_22, %c0_23] : memref<1x32xf32, #tpu.memory_space<vmem>>, vector<1x32xf32>
      %39 = vector.broadcast %38 : vector<1x32xf32> to vector<16x32xf32>
      %40 = arith.mulf %37, %39 : vector<16x32xf32>
      %c0_24 = arith.constant 0 : index
      %c0_25 = arith.constant 0 : index
      %41 = vector.load %arg7[%c0_24, %c0_25] : memref<1x32xf32, #tpu.memory_space<vmem>>, vector<1x32xf32>
      %42 = vector.broadcast %41 : vector<1x32xf32> to vector<16x32xf32>
      %43 = arith.addf %40, %42 : vector<16x32xf32>
      %c0_26 = arith.constant 0 : index
      %c0_27 = arith.constant 0 : index
      %44 = vector.load %arg8[%c0_26, %c0_27] : memref<16x32xf32, #tpu.memory_space<vmem>>, vector<16x32xf32>
      tpu.vector_store %arg8[%c0_26, %c0_27], %43 {strides = array<i32>} : memref<16x32xf32, #tpu.memory_space<vmem>>, vector<16x32xf32>,
    } else {
    }
    return
  }
  func.func @transform_0(%arg0: i32, %arg1: i32) -> (i32, i32) {
    %c0_i32 = arith.constant 0 : i32
    return %arg0, %arg1 : i32, i32
  }
  func.func @transform_1(%arg0: i32, %arg1: i32) -> (i32, i32) {
    %c0_i32 = arith.constant 0 : i32
    %c0_i32_0 = arith.constant 0 : i32
    return %arg1, %c0_i32 : i32, i32
  }
  func.func @transform_2(%arg0: i32, %arg1: i32) -> (i32, i32) {
    %c0_i32 = arith.constant 0 : i32
    %c0_i32_0 = arith.constant 0 : i32
    %c0_i32_1 = arith.constant 0 : i32
    return %c0_i32, %c0_i32_0 : i32, i32
  }
  func.func @transform_3(%arg0: i32, %arg1: i32) -> (i32, i32) {
    %c0_i32 = arith.constant 0 : i32
    %c0_i32_0 = arith.constant 0 : i32
    return %arg0, %c0_i32 : i32, i32
  }
  func.func @transform_4(%arg0: i32, %arg1: i32) -> (i32, i32) {
    %c0_i32 = arith.constant 0 : i32
    %c0_i32_0 = arith.constant 0 : i32
    %c0_i32_1 = arith.constant 0 : i32
    return %c0_i32, %c0_i32_0 : i32, i32
  }
  func.func @transform_5(%arg0: i32, %arg1: i32) -> (i32, i32) {
    %c0_i32 = arith.constant 0 : i32
    %c0_i32_0 = arith.constant 0 : i32
    %c0_i32_1 = arith.constant 0 : i32
    return %c0_i32, %c0_i32_0 : i32, i32
  }
  func.func @transform_6(%arg0: i32, %arg1: i32) -> (i32, i32) {
    %c0_i32 = arith.constant 0 : i32
    %c0_i32_0 = arith.constant 0 : i32
    return %arg0, %c0_i32 : i32, i32
  }
}

module attributes {stable_mosaic.version = 11 : i64} {
  func.func @_matmul_kernel(%arg0: i32, %arg1: i32, %arg2: i32, %arg3: memref<16x32xf32, #tpu.memory_space<vmem>>, %arg4: memref<32x64xbf16, #tpu.memory_space<vmem>>, %arg5: memref<1x64xf32, #tpu.memory_space<vmem>>, %arg6: memref<16x64xbf16, #tpu.memory_space<vmem>>, %arg7: memref<16x64xf32, #tpu.memory_space<vmem>>) attributes {dimension_semantics = [#tpu.dimension_semantics<parallel>, #tpu.dimension_semantics<parallel>, #tpu.dimension_semantics<arbitrary>], iteration_bounds = array<i64: 1, 1, 1>, scalar_prefetch = 0 : i64, scratch_operands = 1 : i64, tpu.core_type = #tpu.core_type<tc>, window_params = [{transform_indices = @transform_0, window_bounds = array<i64: 16, 32>}, {transform_indices = @transform_1, window_bounds = array<i64: 32, 64>}, {transform_indices = @transform_2, window_bounds = array<i64: 1, 64>}, {transform_indices = @transform_3, window_bounds = array<i64: 16, 64>}]} {
    %c0_i32 = arith.constant 0 : i32
    %0 = arith.cmpi eq, %arg2, %c0_i32 : i32
    %1 = arith.extui %0 : i1 to i32
    %c0_i32_0 = arith.constant 0 : i32
    %2 = arith.cmpi ne, %1, %c0_i32_0 : i32
    scf.if %2 {
      %cst_10 = arith.constant 0.000000e+00 : f32
      %13 = vector.broadcast %cst_10 : f32 to vector<16x64xf32>
      %c0_11 = arith.constant 0 : index
      %c0_12 = arith.constant 0 : index
      %14 = vector.load %arg7[%c0_11, %c0_12] : memref<16x64xf32, #tpu.memory_space<vmem>>, vector<16x64xf32>
      tpu.vector_store %arg7[%c0_11, %c0_12], %13 {strides = array<i32>} : memref<16x64xf32, #tpu.memory_space<vmem>>, vector<16x64xf32>,
    } else {
    }
    %c0 = arith.constant 0 : index
    %c0_1 = arith.constant 0 : index
    %3 = vector.load %arg7[%c0, %c0_1] : memref<16x64xf32, #tpu.memory_space<vmem>>, vector<16x64xf32>
    %c0_2 = arith.constant 0 : index
    %c0_3 = arith.constant 0 : index
    %4 = vector.load %arg3[%c0_2, %c0_3] : memref<16x32xf32, #tpu.memory_space<vmem>>, vector<16x32xf32>
    %5 = arith.truncf %4 : vector<16x32xf32> to vector<16x32xbf16>
    %c0_4 = arith.constant 0 : index
    %c0_5 = arith.constant 0 : index
    %6 = vector.load %arg4[%c0_4, %c0_5] : memref<32x64xbf16, #tpu.memory_space<vmem>>, vector<32x64xbf16>
    %cst = arith.constant dense<0.000000e+00> : vector<16x64xf32>
    %7 = tpu.matmul %5, %6, %cst {dimension_numbers = #tpu.dot_dimension_numbers<[1], [0], [0], [1], [0, 0, 1, 1], [], []>} : vector<16x32xbf16>, vector<32x64xbf16>, vector<16x64xf32> -> vector<16x64xf32>
    %8 = arith.addf %3, %7 : vector<16x64xf32>
    %c0_6 = arith.constant 0 : index
    %c0_7 = arith.constant 0 : index
    %9 = vector.load %arg7[%c0_6, %c0_7] : memref<16x64xf32, #tpu.memory_space<vmem>>, vector<16x64xf32>
    tpu.vector_store %arg7[%c0_6, %c0_7], %8 {strides = array<i32>} : memref<16x64xf32, #tpu.memory_space<vmem>>, vector<16x64xf32>,
    %c0_i32_8 = arith.constant 0 : i32
    %10 = arith.cmpi eq, %arg2, %c0_i32_8 : i32
    %11 = arith.extui %10 : i1 to i32
    %c0_i32_9 = arith.constant 0 : i32
    %12 = arith.cmpi ne, %11, %c0_i32_9 : i32
    scf.if %12 {
      %c0_10 = arith.constant 0 : index
      %c0_11 = arith.constant 0 : index
      %13 = vector.load %arg7[%c0_10, %c0_11] : memref<16x64xf32, #tpu.memory_space<vmem>>, vector<16x64xf32>
      %c0_12 = arith.constant 0 : index
      %c0_13 = arith.constant 0 : index
      %14 = vector.load %arg5[%c0_12, %c0_13] : memref<1x64xf32, #tpu.memory_space<vmem>>, vector<1x64xf32>
      %15 = vector.broadcast %14 : vector<1x64xf32> to vector<16x64xf32>
      %16 = arith.addf %13, %15 : vector<16x64xf32>
      %17 = arith.truncf %16 : vector<16x64xf32> to vector<16x64xbf16>
      %c0_14 = arith.constant 0 : index
      %c0_15 = arith.constant 0 : index
      %18 = vector.load %arg6[%c0_14, %c0_15] : memref<16x64xbf16, #tpu.memory_space<vmem>>, vector<16x64xbf16>
      tpu.vector_store %arg6[%c0_14, %c0_15], %17 {strides = array<i32>} : memref<16x64xbf16, #tpu.memory_space<vmem>>, vector<16x64xbf16>,
    } else {
    }
    return
  }
  func.func @transform_0(%arg0: i32, %arg1: i32, %arg2: i32) -> (i32, i32) {
    %c0_i32 = arith.constant 0 : i32
    return %arg0, %arg2 : i32, i32
  }
  func.func @transform_1(%arg0: i32, %arg1: i32, %arg2: i32) -> (i32, i32) {
    %c0_i32 = arith.constant 0 : i32
    return %arg2, %arg1 : i32, i32
  }
  func.func @transform_2(%arg0: i32, %arg1: i32, %arg2: i32) -> (i32, i32) {
    %c0_i32 = arith.constant 0 : i32
    %c0_i32_0 = arith.constant 0 : i32
    return %c0_i32, %arg1 : i32, i32
  }
  func.func @transform_3(%arg0: i32, %arg1: i32, %arg2: i32) -> (i32, i32) {
    %c0_i32 = arith.constant 0 : i32
    return %arg0, %arg1 : i32, i32
  }
}

module attributes {stable_mosaic.version = 11 : i64} {
  func.func @_matmul_resln_kernel(%arg0: i32, %arg1: i32, %arg2: memref<16x128xbf16, #tpu.memory_space<vmem>>, %arg3: memref<128x32xbf16, #tpu.memory_space<vmem>>, %arg4: memref<1x32xf32, #tpu.memory_space<vmem>>, %arg5: memref<16x32xf32, #tpu.memory_space<vmem>>, %arg6: memref<1x32xf32, #tpu.memory_space<vmem>>, %arg7: memref<1x32xf32, #tpu.memory_space<vmem>>, %arg8: memref<16x32xf32, #tpu.memory_space<vmem>>, %arg9: memref<16x32xf32, #tpu.memory_space<vmem>>) attributes {dimension_semantics = [#tpu.dimension_semantics<parallel>, #tpu.dimension_semantics<arbitrary>], iteration_bounds = array<i64: 1, 1>, scalar_prefetch = 0 : i64, scratch_operands = 1 : i64, tpu.core_type = #tpu.core_type<tc>, window_params = [{transform_indices = @transform_0, window_bounds = array<i64: 16, 128>}, {transform_indices = @transform_1, window_bounds = array<i64: 128, 32>}, {pipeline_mode = #tpu.pipeline_mode<synchronous>, transform_indices = @transform_2, window_bounds = array<i64: 1, 32>}, {transform_indices = @transform_3, window_bounds = array<i64: 16, 32>}, {pipeline_mode = #tpu.pipeline_mode<synchronous>, transform_indices = @transform_4, window_bounds = array<i64: 1, 32>}, {pipeline_mode = #tpu.pipeline_mode<synchronous>, transform_indices = @transform_5, window_bounds = array<i64: 1, 32>}, {transform_indices = @transform_6, window_bounds = array<i64: 16, 32>}]} {
    %c0_i32 = arith.constant 0 : i32
    %0 = arith.cmpi eq, %arg1, %c0_i32 : i32
    %1 = arith.extui %0 : i1 to i32
    %c0_i32_0 = arith.constant 0 : i32
    %2 = arith.cmpi ne, %1, %c0_i32_0 : i32
    scf.if %2 {
      %cst_10 = arith.constant 0.000000e+00 : f32
      %12 = vector.broadcast %cst_10 : f32 to vector<16x32xf32>
      %c0_11 = arith.constant 0 : index
      %c0_12 = arith.constant 0 : index
      %13 = vector.load %arg9[%c0_11, %c0_12] : memref<16x32xf32, #tpu.memory_space<vmem>>, vector<16x32xf32>
      tpu.vector_store %arg9[%c0_11, %c0_12], %12 {strides = array<i32>} : memref<16x32xf32, #tpu.memory_space<vmem>>, vector<16x32xf32>,
    } else {
    }
    %c0 = arith.constant 0 : index
    %c0_1 = arith.constant 0 : index
    %3 = vector.load %arg9[%c0, %c0_1] : memref<16x32xf32, #tpu.memory_space<vmem>>, vector<16x32xf32>
    %c0_2 = arith.constant 0 : index
    %c0_3 = arith.constant 0 : index
    %4 = vector.load %arg2[%c0_2, %c0_3] : memref<16x128xbf16, #tpu.memory_space<vmem>>, vector<16x128xbf16>
    %c0_4 = arith.constant 0 : index
    %c0_5 = arith.constant 0 : index
    %5 = vector.load %arg3[%c0_4, %c0_5] : memref<128x32xbf16, #tpu.memory_space<vmem>>, vector<128x32xbf16>
    %cst = arith.constant dense<0.000000e+00> : vector<16x32xf32>
    %6 = tpu.matmul %4, %5, %cst {dimension_numbers = #tpu.dot_dimension_numbers<[1], [0], [0], [1], [0, 0, 1, 1], [], []>} : vector<16x128xbf16>, vector<128x32xbf16>, vector<16x32xf32> -> vector<16x32xf32>
    %7 = arith.addf %3, %6 : vector<16x32xf32>
    %c0_6 = arith.constant 0 : index
    %c0_7 = arith.constant 0 : index
    %8 = vector.load %arg9[%c0_6, %c0_7] : memref<16x32xf32, #tpu.memory_space<vmem>>, vector<16x32xf32>
    tpu.vector_store %arg9[%c0_6, %c0_7], %7 {strides = array<i32>} : memref<16x32xf32, #tpu.memory_space<vmem>>, vector<16x32xf32>,
    %c0_i32_8 = arith.constant 0 : i32
    %9 = arith.cmpi eq, %arg1, %c0_i32_8 : i32
    %10 = arith.extui %9 : i1 to i32
    %c0_i32_9 = arith.constant 0 : i32
    %11 = arith.cmpi ne, %10, %c0_i32_9 : i32
    scf.if %11 {
      %c0_10 = arith.constant 0 : index
      %c0_11 = arith.constant 0 : index
      %12 = vector.load %arg9[%c0_10, %c0_11] : memref<16x32xf32, #tpu.memory_space<vmem>>, vector<16x32xf32>
      %c0_12 = arith.constant 0 : index
      %c0_13 = arith.constant 0 : index
      %13 = vector.load %arg4[%c0_12, %c0_13] : memref<1x32xf32, #tpu.memory_space<vmem>>, vector<1x32xf32>
      %14 = vector.broadcast %13 : vector<1x32xf32> to vector<16x32xf32>
      %15 = arith.addf %12, %14 : vector<16x32xf32>
      %c0_14 = arith.constant 0 : index
      %c0_15 = arith.constant 0 : index
      %16 = vector.load %arg5[%c0_14, %c0_15] : memref<16x32xf32, #tpu.memory_space<vmem>>, vector<16x32xf32>
      %17 = arith.addf %15, %16 : vector<16x32xf32>
      %cst_16 = arith.constant dense<0.000000e+00> : vector<16xf32>
      %18 = vector.multi_reduction <add>, %17, %cst_16 [1] : vector<16x32xf32> to vector<16xf32>
      %19 = vector.shape_cast %18 : vector<16xf32> to vector<16x1xf32>
      %cst_17 = arith.constant 3.200000e+01 : f32
      %20 = vector.broadcast %cst_17 : f32 to vector<16x1xf32>
      %21 = arith.divf %19, %20 : vector<16x1xf32>
      %22 = arith.mulf %17, %17 : vector<16x32xf32>
      %cst_18 = arith.constant dense<0.000000e+00> : vector<16xf32>
      %23 = vector.multi_reduction <add>, %22, %cst_18 [1] : vector<16x32xf32> to vector<16xf32>
      %24 = vector.shape_cast %23 : vector<16xf32> to vector<16x1xf32>
      %cst_19 = arith.constant 3.200000e+01 : f32
      %25 = vector.broadcast %cst_19 : f32 to vector<16x1xf32>
      %26 = arith.divf %24, %25 : vector<16x1xf32>
      %27 = arith.mulf %21, %21 : vector<16x1xf32>
      %28 = arith.subf %26, %27 : vector<16x1xf32>
      %cst_20 = arith.constant 0.000000e+00 : f32
      %29 = vector.broadcast %cst_20 : f32 to vector<16x1xf32>
      %30 = arith.maximumf %28, %29 : vector<16x1xf32>
      %31 = vector.broadcast %21 : vector<16x1xf32> to vector<16x32xf32>
      %32 = arith.subf %17, %31 : vector<16x32xf32>
      %cst_21 = arith.constant 9.99999974E-6 : f32
      %33 = vector.broadcast %cst_21 : f32 to vector<16x1xf32>
      %34 = arith.addf %30, %33 : vector<16x1xf32>
      %35 = math.rsqrt %34 : vector<16x1xf32>
      %36 = vector.broadcast %35 : vector<16x1xf32> to vector<16x32xf32>
      %37 = arith.mulf %32, %36 : vector<16x32xf32>
      %c0_22 = arith.constant 0 : index
      %c0_23 = arith.constant 0 : index
      %38 = vector.load %arg6[%c0_22, %c0_23] : memref<1x32xf32, #tpu.memory_space<vmem>>, vector<1x32xf32>
      %39 = vector.broadcast %38 : vector<1x32xf32> to vector<16x32xf32>
      %40 = arith.mulf %37, %39 : vector<16x32xf32>
      %c0_24 = arith.constant 0 : index
      %c0_25 = arith.constant 0 : index
      %41 = vector.load %arg7[%c0_24, %c0_25] : memref<1x32xf32, #tpu.memory_space<vmem>>, vector<1x32xf32>
      %42 = vector.broadcast %41 : vector<1x32xf32> to vector<16x32xf32>
      %43 = arith.addf %40, %42 : vector<16x32xf32>
      %c0_26 = arith.constant 0 : index
      %c0_27 = arith.constant 0 : index
      %44 = vector.load %arg8[%c0_26, %c0_27] : memref<16x32xf32, #tpu.memory_space<vmem>>, vector<16x32xf32>
      tpu.vector_store %arg8[%c0_26, %c0_27], %43 {strides = array<i32>} : memref<16x32xf32, #tpu.memory_space<vmem>>, vector<16x32xf32>,
    } else {
    }
    return
  }
  func.func @transform_0(%arg0: i32, %arg1: i32) -> (i32, i32) {
    %c0_i32 = arith.constant 0 : i32
    return %arg0, %arg1 : i32, i32
  }
  func.func @transform_1(%arg0: i32, %arg1: i32) -> (i32, i32) {
    %c0_i32 = arith.constant 0 : i32
    %c0_i32_0 = arith.constant 0 : i32
    return %arg1, %c0_i32 : i32, i32
  }
  func.func @transform_2(%arg0: i32, %arg1: i32) -> (i32, i32) {
    %c0_i32 = arith.constant 0 : i32
    %c0_i32_0 = arith.constant 0 : i32
    %c0_i32_1 = arith.constant 0 : i32
    return %c0_i32, %c0_i32_0 : i32, i32
  }
  func.func @transform_3(%arg0: i32, %arg1: i32) -> (i32, i32) {
    %c0_i32 = arith.constant 0 : i32
    %c0_i32_0 = arith.constant 0 : i32
    return %arg0, %c0_i32 : i32, i32
  }
  func.func @transform_4(%arg0: i32, %arg1: i32) -> (i32, i32) {
    %c0_i32 = arith.constant 0 : i32
    %c0_i32_0 = arith.constant 0 : i32
    %c0_i32_1 = arith.constant 0 : i32
    return %c0_i32, %c0_i32_0 : i32, i32
  }
  func.func @transform_5(%arg0: i32, %arg1: i32) -> (i32, i32) {
    %c0_i32 = arith.constant 0 : i32
    %c0_i32_0 = arith.constant 0 : i32
    %c0_i32_1 = arith.constant 0 : i32
    return %c0_i32, %c0_i32_0 : i32, i32
  }
  func.func @transform_6(%arg0: i32, %arg1: i32) -> (i32, i32) {
    %c0_i32 = arith.constant 0 : i32
    %c0_i32_0 = arith.constant 0 : i32
    return %arg0, %c0_i32 : i32, i32
  }
}

</mosaic_0001>

<bundles_post_ra>
// kernel: transformer_forward.38
= control target key start
LH: loop header
LB: loop body
LE: loop exit
PB: predicated region body
PF: predicated region fallthrough
CT: control target
= control target key end

     0   :  { %vm19_vm0 = vcmask 785408   ;;  %v145_v0 = vmov 0.0   ;;  %vm146_vm1 = vmmov 0   ;;  %vm43_vm2 = vcmask 261120   ;;  %s192_s1 = inlined_call_operand.vmem [shape: bf16[32,96], index: 1, kind: input, shape index: {}]   ;;  %s193_s0 = inlined_call_operand.vmem [shape: f32[16,32], index: 0, kind: input, shape index: {}]   ;;  %s194_s2 = inlined_call_operand.vmem [shape: f32[1,96], index: 2, kind: input, shape index: {}]   ;;  %s195_s3 = inlined_call_operand.vmem [shape: bf16[16,96], index: 3, kind: output, shape index: {}]  }
   0x1   :  { %133 = vmatprep.subr.bf16.mxu0 %v145_v0  ;;  %v143_v1 = vld [vmem:[%s192_s1] sm:$0xff]   ;;  %137 = vmatprep.mubr.msk.bf16.mxu0 %vm146_vm1, %v145_v0  ;;  %20 = vst.msk [vmem:[#allocation2] sm:$0xff] %vm19_vm0, %v145_v0  ;;  %21 = vst.msk [vmem:[#allocation2 + $0x8] sm:$0xff] %vm19_vm0, %v145_v0  ;;  %v144_v2 = vld [vmem:[%s192_s1 + $0x8] sm:$0xff]   ;;  %vm115_vm3 = vcmask 781312  }
   0x2   :  { %134 = vmatpush3.bf16.msra.mxu0 %v143_v1  ;;  %v24_v3 = vld [vmem:[%s193_s0] sm:$0xff]  ;;  %v25_v4 = vld [vmem:[%s193_s0 + $0x8] sm:$0xff] }
   0x3   :  { %135 = vmatprep.subr.bf16.mxu0 %v145_v0  ;;  %v26_v5 = vpack.c.bf16 %v25_v4, %v24_v3  ;;  %v125_v14 = vld [vmem:[%s194_s2] ss:$0 sm:$0xff] }
   0x6   :  { %136 = vmatpush3.bf16.msra.mxu0 %v144_v2 }
   0x8   :  { %v22_v6 = vld [vmem:[#allocation2] sm:$0xff]  ;;  %v23_v8 = vld [vmem:[#allocation2 + $0x8] sm:$0xff] }
   0x9   :  { %138 = vmatmul.mubr.msk.bf16.vlgmr.msra.gmra.mrb[0].mxu0 %vm43_vm2, %v26_v5 }
  0xdc   :  { %v81_v7 = vpop.f32.mrb[0].mxu0 }
  0xdd   :  { %v88_v9 = vadd.f32 %v81_v7, %v22_v6  ;;  %v139_v10 = vpop.f32.mrb[1].mxu0 }
  0xde   :  { %v84_v11 = vpop.f32.mrb[2].mxu0 }
  0xdf   :  { %91 = vst.msk [vmem:[#allocation2] sm:$0xff] %vm19_vm0, %v88_v9  ;;  %v89_v12 = vadd.f32 %v84_v11, %v23_v8  ;;  %v140_v13 = vpop.f32.mrb[3].mxu0 }
  0xe1   :  { %92 = vst.msk [vmem:[#allocation2 + $0x8] sm:$0xff] %vm19_vm0, %v89_v12 }
  0xe6   :  { %v96_v15 = vld [vmem:[#allocation2] sm:$0xff] }
  0xe7   :  { %v105_v16 = vadd.f32 %v125_v14, %v96_v15 }
  0xe8   :  { %v97_v17 = vld [vmem:[#allocation2 + $0x8] sm:$0xff] }
  0xe9   :  { %v128_v18 = vpack.c.bf16 %v105_v16, %v105_v16  ;;  %v106_v19 = vadd.f32 %v125_v14, %v97_v17 }
  0xeb   :  { %116 = vst.msk [vmem:[%s195_s3] sm:$0xf] %vm115_vm3, %v128_v18  ;;  %v129_v20 = vpack.c.bf16 %v106_v19, %v106_v19 }
  0xed   :  { %117 = vst.msk [vmem:[%s195_s3 + $0x4] sm:$0xf] %vm115_vm3, %v129_v20 }

// kernel: transformer_forward.41
= control target key start
LH: loop header
LB: loop body
LE: loop exit
PB: predicated region body
PF: predicated region fallthrough
CT: control target
= control target key end

     0   :  { %vm19_vm0 = vcmask 261120   ;;  %v144_v0 = vmov 0.0   ;;  %vm145_vm1 = vmmov 0   ;;  %vm114_vm2 = vcmask 257024   ;;  %s192_s1 = inlined_call_operand.vmem [shape: bf16[32,32], index: 1, kind: input, shape index: {}]   ;;  %s193_s0 = inlined_call_operand.vmem [shape: f32[16,32], index: 0, kind: input, shape index: {}]   ;;  %s194_s2 = inlined_call_operand.vmem [shape: f32[1,32], index: 2, kind: input, shape index: {}]   ;;  %s195_s3 = inlined_call_operand.vmem [shape: bf16[16,32], index: 3, kind: output, shape index: {}]  }
   0x1   :  { %132 = vmatprep.subr.bf16.mxu0 %v144_v0  ;;  %v142_v1 = vld [vmem:[%s192_s1] sm:$0xff]   ;;  %136 = vmatprep.mubr.msk.bf16.mxu0 %vm145_vm1, %v144_v0  ;;  %20 = vst.msk [vmem:[#allocation2] sm:$0xff] %vm19_vm0, %v144_v0  ;;  %21 = vst.msk [vmem:[#allocation2 + $0x8] sm:$0xff] %vm19_vm0, %v144_v0  ;;  %v143_v2 = vld [vmem:[%s192_s1 + $0x8] sm:$0xff]  }
   0x2   :  { %133 = vmatpush3.bf16.msra.mxu0 %v142_v1  ;;  %v24_v3 = vld [vmem:[%s193_s0] sm:$0xff]  ;;  %v25_v4 = vld [vmem:[%s193_s0 + $0x8] sm:$0xff] }
   0x3   :  { %134 = vmatprep.subr.bf16.mxu0 %v144_v0  ;;  %v26_v5 = vpack.c.bf16 %v25_v4, %v24_v3  ;;  %v124_v14 = vld [vmem:[%s194_s2] ss:$0 sm:$0xff] }
   0x6   :  { %135 = vmatpush3.bf16.msra.mxu0 %v143_v2 }
   0x8   :  { %v22_v6 = vld [vmem:[#allocation2] sm:$0xff]  ;;  %v23_v8 = vld [vmem:[#allocation2 + $0x8] sm:$0xff] }
   0x9   :  { %137 = vmatmul.mubr.msk.bf16.vlgmr.msra.gmra.mrb[0].mxu0 %vm19_vm0, %v26_v5 }
  0xdc   :  { %v81_v7 = vpop.f32.mrb[0].mxu0 }
  0xdd   :  { %v88_v9 = vadd.f32 %v81_v7, %v22_v6  ;;  %v138_v10 = vpop.f32.mrb[1].mxu0 }
  0xde   :  { %v84_v11 = vpop.f32.mrb[2].mxu0 }
  0xdf   :  { %90 = vst.msk [vmem:[#allocation2] sm:$0xff] %vm19_vm0, %v88_v9  ;;  %v89_v12 = vadd.f32 %v84_v11, %v23_v8  ;;  %v139_v13 = vpop.f32.mrb[3].mxu0 }
  0xe1   :  { %91 = vst.msk [vmem:[#allocation2 + $0x8] sm:$0xff] %vm19_vm0, %v89_v12 }
  0xe6   :  { %v95_v15 = vld [vmem:[#allocation2] sm:$0xff] }
  0xe7   :  { %v104_v16 = vadd.f32 %v124_v14, %v95_v15 }
  0xe8   :  { %v96_v17 = vld [vmem:[#allocation2 + $0x8] sm:$0xff] }
  0xe9   :  { %v127_v18 = vpack.c.bf16 %v104_v16, %v104_v16  ;;  %v105_v19 = vadd.f32 %v124_v14, %v96_v17 }
  0xeb   :  { %115 = vst.msk [vmem:[%s195_s3] sm:$0xf] %vm114_vm2, %v127_v18  ;;  %v128_v20 = vpack.c.bf16 %v105_v19, %v105_v19 }
  0xed   :  { %116 = vst.msk [vmem:[%s195_s3 + $0x4] sm:$0xf] %vm114_vm2, %v128_v20 }

// kernel: transformer_forward.40
= control target key start
LH: loop header
LB: loop body
LE: loop exit
PB: predicated region body
PF: predicated region fallthrough
CT: control target
= control target key end

     0   :  { %vm28_vm0 = vcmask 261120   ;;  %v207_v0 = vmov 0.0   ;;  %vm208_vm1 = vmmov 0   ;;  %s285_s1 = inlined_call_operand.vmem [shape: bf16[32,32], index: 1, kind: input, shape index: {}]   ;;  %s286_s0 = inlined_call_operand.vmem [shape: bf16[16,32], index: 0, kind: input, shape index: {}]   ;;  %s287_s2 = inlined_call_operand.vmem [shape: f32[1,32], index: 2, kind: input, shape index: {}]   ;;  %s288_s3 = inlined_call_operand.vmem [shape: f32[16,32], index: 3, kind: input, shape index: {}]   ;;  %s289_s4 = inlined_call_operand.vmem [shape: f32[1,32], index: 4, kind: input, shape index: {}]   ;;  %s290_s5 = inlined_call_operand.vmem [shape: f32[1,32], index: 5, kind: input, shape index: {}]   ;;  %s291_s6 = inlined_call_operand.vmem [shape: f32[16,32], index: 6, kind: output, shape index: {}]  }
   0x1   :  { %190 = vmatprep.subr.bf16.mxu0 %v207_v0  ;;  %v200_v1 = vld [vmem:[%s285_s1] sm:$0xff]   ;;  %194 = vmatprep.mubr.msk.bf16.mxu0 %vm208_vm1, %v207_v0  ;;  %29 = vst.msk [vmem:[#allocation2] sm:$0xff] %vm28_vm0, %v207_v0  ;;  %30 = vst.msk [vmem:[#allocation2 + $0x8] sm:$0xff] %vm28_vm0, %v207_v0  ;;  %v201_v2 = vld [vmem:[%s285_s1 + $0x8] sm:$0xff]  }
   0x2   :  { %191 = vmatpush3.bf16.msra.mxu0 %v200_v1  ;;  %v202_v3 = vld [vmem:[%s286_s0] sm:$0xff]   ;;  %v120_v17 = vld [vmem:[%s288_s3 + $0x8] sm:$0xff] }
   0x3   :  { %192 = vmatprep.subr.bf16.mxu0 %v207_v0  ;;  %v184_v12 = vld [vmem:[%s287_s2] ss:$0 sm:$0xff] }
   0x4   :  { %v119_v14 = vld [vmem:[%s288_s3] sm:$0xff] }
   0x5   :  { %v185_v45 = vld [vmem:[%s289_s4] ss:$0 sm:$0xff] }
   0x6   :  { %193 = vmatpush3.bf16.msra.mxu0 %v201_v2  ;;  %v186_v47 = vld [vmem:[%s290_s5] ss:$0 sm:$0xff] }
   0x8   :  { %v31_v4 = vld [vmem:[#allocation2] sm:$0xff]  ;;  %v32_v6 = vld [vmem:[#allocation2 + $0x8] sm:$0xff] }
   0x9   :  { %195 = vmatmul.mubr.msk.bf16.vlgmr.msra.gmra.mrb[0].mxu0 %vm28_vm0, %v202_v3 }
  0xdc   :  { %v94_v5 = vpop.f32.mrb[0].mxu0 }
  0xdd   :  { %v101_v7 = vadd.f32 %v94_v5, %v31_v4  ;;  %v196_v8 = vpop.f32.mrb[1].mxu0 }
  0xde   :  { %v97_v9 = vpop.f32.mrb[2].mxu0 }
  0xdf   :  { %103 = vst.msk [vmem:[#allocation2] sm:$0xff] %vm28_vm0, %v101_v7  ;;  %v102_v10 = vadd.f32 %v97_v9, %v32_v6  ;;  %v197_v11 = vpop.f32.mrb[3].mxu0 }
  0xe1   :  { %104 = vst.msk [vmem:[#allocation2 + $0x8] sm:$0xff] %vm28_vm0, %v102_v10 }
  0xe6   :  { %v108_v13 = vld [vmem:[#allocation2] sm:$0xff] }
  0xe7   :  { %v117_v15 = vadd.f32 %v184_v12, %v108_v13 }
  0xe8   :  { %v109_v16 = vld [vmem:[#allocation2 + $0x8] sm:$0xff] }
  0xe9   :  { %v121_v18 = vadd.f32 %v119_v14, %v117_v15  ;;  %v118_v19 = vadd.f32 %v184_v12, %v109_v16 }
  0xeb   :  { %v123_v20 = vsel %vm28_vm0, %v121_v18, 0.0  ;;  %v132_v21 = vmul.f32 %v121_v18, %v121_v18  ;;  %v122_v22 = vadd.f32 %v120_v17, %v118_v19 }
  0xec   :  { %124 = vadd.xlane.f32.xlu0 %v123_v20 }
  0xed   :  { %v134_v23 = vsel %vm28_vm0, %v132_v21, 0.0  ;;  %v133_v24 = vmul.f32 %v122_v22, %v122_v22  ;;  %v126_v25 = vsel %vm28_vm0, %v122_v22, 0.0 }
  0xee   :  { %135 = vadd.xlane.f32.xlu1 %v134_v23 }
  0xef   :  { %v137_v26 = vsel %vm28_vm0, %v133_v24, 0.0 }
  0xf0   :  { %127 = vadd.xlane.f32.xlu0 %v126_v25 }
  0xf2   :  { %138 = vadd.xlane.f32.xlu1 %v137_v26 }
 0x179   :  { %v125_v27 = vpop.xlane.xlu0 %124 }
 0x17a   :  { %v130_v28 = vmul.f32 0.03125, %v125_v27 }
 0x17b   :  { %v136_v29 = vpop.xlane.xlu1 %135 }
 0x17c   :  { %v142_v30 = vmul.f32 %v130_v28, %v130_v28  ;;  %v140_v31 = vmul.f32 0.03125, %v136_v29  ;;  %v148_v43 = vsub.f32 %v121_v18, %v130_v28 }
 0x17d   :  { %v128_v32 = vpop.xlane.xlu0 %127 }
 0x17e   :  { %v144_v33 = vsub.f32 %v140_v31, %v142_v30  ;;  %v131_v34 = vmul.f32 0.03125, %v128_v32 }
 0x17f   :  { %v139_v35 = vpop.xlane.xlu1 %138 }
 0x180   :  { %v146_v36 = vmax.f32 %v144_v33, 0.0  ;;  %v143_v37 = vmul.f32 %v131_v34, %v131_v34  ;;  %v141_v38 = vmul.f32 0.03125, %v139_v35  ;;  %v149_v49 = vsub.f32 %v122_v22, %v131_v34 }
 0x182   :  { %v150_v39 = vadd.f32 1e-05, %v146_v36  ;;  %v145_v40 = vsub.f32 %v141_v38, %v143_v37 }
 0x184   :  { %203 = vrsqrt.f32 %v150_v39  ;;  %v147_v41 = vmax.f32 %v145_v40, 0.0 }
 0x186   :  { %v151_v42 = vadd.f32 1e-05, %v147_v41 }
 0x188   :  { %205 = vrsqrt.f32 %v151_v42 }
 0x18e   :  { %v204_v44 = vpop.eup %203 }
 0x18f   :  { %v154_v46 = vmul.f32 %v204_v44, %v148_v43 }
 0x191   :  { %v163_v48 = vmul.f32 %v185_v45, %v154_v46 }
 0x192   :  { %v206_v50 = vpop.eup %205 }
 0x193   :  { %v172_v51 = vadd.f32 %v186_v47, %v163_v48  ;;  %v155_v52 = vmul.f32 %v206_v50, %v149_v49 }
 0x195   :  { %174 = vst.msk [vmem:[%s291_s6] sm:$0xff] %vm28_vm0, %v172_v51  ;;  %v164_v53 = vmul.f32 %v185_v45, %v155_v52 }
 0x197   :  { %v173_v54 = vadd.f32 %v186_v47, %v164_v53 }
 0x199   :  { %175 = vst.msk [vmem:[%s291_s6 + $0x8] sm:$0xff] %vm28_vm0, %v173_v54 }

// kernel: transformer_forward.39
= control target key start
LH: loop header
LB: loop body
LE: loop exit
PB: predicated region body
PF: predicated region fallthrough
CT: control target
= control target key end

     0   :  { %s657_s12 = smov 0   ;;  %s659_s13 = smov 0   ;;  %s713_s0 = inlined_call_operand.vmem [shape: bf16[8,8,8], index: 0, kind: input, shape index: {}]   ;;  %s714_s1 = inlined_call_operand.vmem [shape: bf16[8,8,8], index: 1, kind: input, shape index: {}]   ;;  %s715_s2 = inlined_call_operand.vmem [shape: bf16[8,8,8], index: 2, kind: input, shape index: {}]   ;;  %s716_s3 = inlined_call_operand.vmem [shape: bf16[8,8,8], index: 3, kind: output, shape index: {}]  }
   0x1   :  { %s661_s14 = smov 0  }
   0x2 LB: > { %s32_s15 = sadd.s32 1, %s627_s13  ;;  %p548_p0 = scmp.ge.s32.totalorder %s631_s14, 1  ;;  %s631_s14 = sphi %s661_s14, %s13_s14   ;;  %s627_s13 = sphi %s659_s13, %s718_s13   ;;  %s623_s12 = sphi %s657_s12, %s717_s12  }
   0x3   : > { %p34_p1 = scmp.ge.s32.totalorder %s32_s15, 8  ;;  %p190_p2 = scmp.lt.s32.totalorder %s631_s14, 9 }
   0x5   : > { %s720_s15 = smov (%p34_p1, %s32_s15), 0  ;;  %p191_p3 = pnand %p548_p0, %p190_p2 }
   0x6   : > { %p232_p4 = scmp.lt.s32.totalorder (!%p191_p3), %s623_s12, 7  ;;  %vm268_vm0 = vcmask (!%p191_p3), 64512   ;;  %v633_v0 = vmov (!%p191_p3), 0.0   ;;  %vm634_vm1 = vmmov (!%p191_p3), 0   ;;  %vm265_vm2 = vcmask (!%p191_p3), 7168  }
   0x7   : > { %194 = sbr.rel (%p191_p3) target bundleno = 824 (0x338), region = 32  ;;  %561 = vmatprep.subr.bf16.mxu0 (!%p191_p3), %v633_v0  ;;  %269 = vst.msk [vmem:[#allocation4] sm:$0xff] (!%p191_p3), %vm268_vm0, %v633_v0  ;;  %563 = vmatprep.mubr.msk.bf16.mxu0 (!%p191_p3), %vm634_vm1, %v633_v0  ;;  %v635_v7 = vmov (!%p191_p3), -1e+30   ;;  %v330_v8 = vlaneseq (!%p191_p3)  ;;  %v636_v17 = vmov (!%p191_p3), 0   ;;  %vm375_vm4 = vcmask (!%p191_p3), 1043456  }
   0x8   : > { %567 = vmatprep.subr.bf16.mxu1 (!%p191_p3), %v633_v0  ;;  %569 = vmatprep.mubr.msk.bf16.mxu1 (!%p191_p3), %vm634_vm1, %v633_v0  ;;  %266 = vst.msk [vmem:[#allocation2] sm:$0xff] (!%p191_p3), %vm265_vm2, %v635_v7  ;;  %267 = vst.msk [vmem:[#allocation3] sm:$0xff] (!%p191_p3), %vm265_vm2, %v633_v0  ;;  %vm435_vm5 = vcmask (!%p191_p3), 60416  }
   0x9   : > { %v331_v9 = vshrl.u32 (!%p191_p3), %v330_v8, 7  ;;  %v335_v10 = vand.u32 (!%p191_p3), 127, %v330_v8  ;;  %601 = vset.pattern.permute.xlu0 (!%p191_p3), %v636_v17  ;;  %602 = vset.pattern.permute.xlu1 (!%p191_p3), %v636_v17 }
   0xb   : > { %vm338_vm3 = vcmp.le.s32.totalorder (!%p191_p3), %v335_v10, %v331_v9 }
   0xe   : > { %s722_s12 = smov (!%p232_p4, %s623_s12), 7  ;;  %v364_v38 = vld [vmem:[#allocation4] sm:$0xff] }
   0xf   : > { %s676_s16 = sshll.u32 %s722_s12, 2  ;;  %v340_v18 = vld [vmem:[#allocation2] sm:$0xff]  ;;  %v356_v32 = vld [vmem:[#allocation3] sm:$0xff] }
  0x10   : > { %s245_s19 = scalar_lea.vmem %s714_s1, %s676_s16  ;;  %s238_s22 = scalar_lea.vmem %s713_s0, %s676_s16 }
  0x11   : > { %v281_v1 = vld [vmem:[%s245_s19] sm:$0xf]  ;;  %s252_s25 = scalar_lea.vmem %s715_s2, %s676_s16  ;;  %s259_s28 = scalar_lea.vmem %s716_s3, %s676_s16 }
  0x12   : > { %v277_v2 = vld [vmem:[%s238_s22] sm:$0xf]  ;;  %v288_v3 = vsel %vm268_vm0, %v281_v1, 0 }
  0x13   : > { %v278_v4 = vunpack.c.l.bf16 %v277_v2  ;;  %562 = vmatpush3.bf16.xpose.msra.mxu0 %v288_v3  ;;  %v282_v22 = vld [vmem:[%s252_s25] sm:$0xf] }
  0x14   : > { %v377_v23 = vsel %vm375_vm4, %v282_v22, 0 }
  0x15   : > { %v279_v5 = vmul.f32 0.35355338, %v278_v4  ;;  %568 = vmatpush3.bf16.msra.mxu1 %v377_v23 }
  0x17   : > { %v280_v6 = vpack.c.bf16 %v279_v5, %v279_v5 }
  0x1a   : > { %564 = vmatmul.mubr.msk.bf16.vlgmr.msra.gmra.mrb[0].mxu0 %vm268_vm0, %v280_v6 }
  0xed   : > { %v324_v11 = vpop.f32.mrb[0].mxu0 }
  0xee   : > { %v339_v12 = vsel %vm338_vm3, %v324_v11, -1e+30  ;;  %v565_v13 = vpop.f32.mrb[1].mxu0 }
  0xef   : > { %v327_v14 = vpop.f32.mrb[2].mxu0  ;;  %v341_v15 = vsel %vm268_vm0, %v339_v12, -inf }
  0xf0   : > { %342 = vmax.xlane.f32.xlu0 %v341_v15  ;;  %v566_v16 = vpop.f32.mrb[3].mxu0 }
 0x17d   : > { %v343_v19 = vpop.xlane.xlu0 %342 }
 0x17e   : > { %v344_v20 = vmax.f32 %v340_v18, %v343_v19 }
 0x180   : > { %v345_v21 = vsub.f32 %v340_v18, %v344_v20  ;;  %421 = vst.msk [vmem:[#allocation2] sm:$0xff] %vm265_vm2, %v344_v20  ;;  %350 = vperm.xlu0 %601, %v344_v20  }
 0x182   : > { %v346_v30 = vmul.f32 1.442695, %v345_v21 }
 0x1ff   : > { %v351_v24 = vpop.permute.xlu0 %350 }
 0x200   : > { %v353_v25 = vsub.f32 %v339_v12, %v351_v24 }
 0x202   : > { %v354_v26 = vmul.f32 1.442695, %v353_v25 }
 0x204   : > { %603 = vpow2.f32 %v354_v26 }
 0x205   : > { %605 = vpow2.f32 %v346_v30 }
 0x20e   : > { %v604_v27 = vpop.eup %603 }
 0x20f   : > { %v358_v28 = vsel %vm268_vm0, %v604_v27, 0.0  ;;  %v371_v29 = vpack.c.bf16 %v604_v27, %v604_v27  ;;  %v606_v31 = vpop.eup %605 }
 0x210   : > { %359 = vadd.xlane.f32.xlu1 %v358_v28  ;;  %v357_v33 = vmul.f32 %v606_v31, %v356_v32 }
 0x211   : > { %570 = vmatmul.mubr.msk.bf16.vlgmr.msra.gmra.mrb[0].mxu1 %vm268_vm0, %v371_v29 }
 0x221   : > { %367 = vperm.xlu1 %602, %v606_v31  }
 0x29d   : > { %v360_v34 = vpop.xlane.xlu1 %359 }
 0x29e   : > { %v361_v35 = vadd.f32 %v360_v34, %v357_v33 }
 0x2a0   : > { %363 = vst.msk [vmem:[#allocation3] sm:$0xff] %vm265_vm2, %v361_v35 }
 0x2a1   : > { %v368_v39 = vpop.permute.xlu1 %367 }
 0x2a2   : > { %v370_v40 = vmul.f32 %v368_v39, %v364_v38 }
 0x2a7   : > { %v425_v36 = vld [vmem:[#allocation3] sm:$0xff] }
 0x2a8   : > { %607 = vrcp.f32 %v425_v36 }
 0x2b2   : > { %v608_v37 = vpop.eup %607 }
 0x2b3   : > { %430 = vperm.xlu1 %602, %v608_v37  }
 0x2e4   : > { %v413_v41 = vpop.f32.mrb[0].mxu1 }
 0x2e5   : > { %v419_v42 = vadd.f32 %v413_v41, %v370_v40  ;;  %v571_v43 = vpop.f32.mrb[1].mxu1 }
 0x2e6   : > { %v416_v44 = vpop.f32.mrb[2].mxu1 }
 0x2e7   : > { %420 = vst.msk [vmem:[#allocation4] sm:$0xff] %vm268_vm0, %v419_v42  ;;  %v572_v45 = vpop.f32.mrb[3].mxu1 }
 0x2ee   : > { %v427_v46 = vld [vmem:[#allocation4] sm:$0xff] }
 0x332   : > { %v431_v47 = vpop.permute.xlu1 %430 }
 0x333   : > { %v433_v48 = vmul.f32 %v431_v47, %v427_v46 }
 0x335   : > { %v434_v49 = vpack.c.bf16 %v433_v48, %v433_v48 }
 0x337   : > { %436 = vst.msk [vmem:[%s259_s28] sm:$0xf] %vm435_vm5, %v434_v49 }
 0x338 PF: > { %s13_s14 = sadd.s32 1, %s631_s14   ;;  %s717_s12 = smov %s627_s13 }
 0x339   : > { %p10_p5 = scmp.ge.s32.totalorder %s13_s14, 10   ;;  %s718_s13 = smov %s720_s15 }
 0x33b   :  { %12 = sbr.rel (!%p10_p5) target bundleno = 2 (0x2), region = 80 }

// kernel: transformer_forward.31
= control target key start
LH: loop header
LB: loop body
LE: loop exit
PB: predicated region body
PF: predicated region fallthrough
CT: control target
= control target key end

     0   :  { %v149_v0 = vmov 0.0   ;;  %vm150_vm0 = vmmov 0   ;;  %vm42_vm1 = vcmask 261120   ;;  %s189_s1 = inlined_call_operand.vmem [shape: bf16[32,128], index: 1, kind: input, shape index: {}]   ;;  %s190_s0 = inlined_call_operand.vmem [shape: f32[16,32], index: 0, kind: input, shape index: {}]   ;;  %s191_s2 = inlined_call_operand.vmem [shape: f32[1,128], index: 2, kind: input, shape index: {}]   ;;  %s192_s3 = inlined_call_operand.vmem [shape: bf16[16,128], index: 3, kind: output, shape index: {}]  }
   0x1   :  { %137 = vmatprep.subr.bf16.mxu0 %v149_v0  ;;  %v147_v1 = vld [vmem:[%s189_s1] sm:$0xff]   ;;  %141 = vmatprep.mubr.msk.bf16.mxu0 %vm150_vm0, %v149_v0  ;;  %v148_v2 = vld [vmem:[%s189_s1 + $0x8] sm:$0xff]  }
   0x2   :  { %138 = vmatpush3.bf16.msra.mxu0 %v147_v1  ;;  %v23_v3 = vld [vmem:[%s190_s0] sm:$0xff]  ;;  %v24_v4 = vld [vmem:[%s190_s0 + $0x8] sm:$0xff] }
   0x3   :  { %139 = vmatprep.subr.bf16.mxu0 %v149_v0  ;;  %v25_v5 = vpack.c.bf16 %v24_v4, %v23_v3  ;;  %v124_v6 = vld [vmem:[%s191_s2] ss:$0 sm:$0xff] }
   0x6   :  { %140 = vmatpush3.bf16.msra.mxu0 %v148_v2 }
   0x9   :  { %142 = vmatmul.mubr.msk.bf16.vlgmr.msra.gmra.mrb[0].mxu0 %vm42_vm1, %v25_v5 }
  0xdc   :  { %v80_v7 = vpop.f32.mrb[0].mxu0 }
  0xdd   :  { %v103_v8 = vadd.f32 %v124_v6, %v80_v7  ;;  %v143_v9 = vpop.f32.mrb[1].mxu0 }
  0xde   :  { %v83_v10 = vpop.f32.mrb[2].mxu0 }
  0xdf   :  { %v104_v11 = vadd.f32 %v124_v6, %v83_v10  ;;  %v144_v12 = vpop.f32.mrb[3].mxu0  ;;  %v105_v13 = vmax.f32 %v103_v8, 0.0 }
  0xe1   :  { %v106_v14 = vmax.f32 %v104_v11, 0.0 }
  0xe3   :  { %v132_v15 = vpack.c.bf16 %v106_v14, %v105_v13 }
  0xe5   :  { %133 = vst [vmem:[%s192_s3] sm:$0xff] %v132_v15  }

// kernel: transformer_forward.29
= control target key start
LH: loop header
LB: loop body
LE: loop exit
PB: predicated region body
PF: predicated region fallthrough
CT: control target
= control target key end

     0   :  { %s640_s12 = smov 0   ;;  %s642_s13 = smov 0   ;;  %s696_s0 = inlined_call_operand.vmem [shape: bf16[8,8,8], index: 0, kind: input, shape index: {}]   ;;  %s697_s1 = inlined_call_operand.vmem [shape: bf16[8,8,8], index: 1, kind: input, shape index: {}]   ;;  %s698_s2 = inlined_call_operand.vmem [shape: bf16[8,8,8], index: 2, kind: input, shape index: {}]   ;;  %s699_s3 = inlined_call_operand.vmem [shape: bf16[8,8,8], index: 3, kind: output, shape index: {}]  }
   0x1   :  { %s644_s14 = smov 0  }
   0x2 LB: > { %s32_s15 = sadd.s32 1, %s610_s13  ;;  %p531_p0 = scmp.ge.s32.totalorder %s614_s14, 1  ;;  %s614_s14 = sphi %s644_s14, %s13_s14   ;;  %s610_s13 = sphi %s642_s13, %s701_s13   ;;  %s606_s12 = sphi %s640_s12, %s700_s12  }
   0x3   : > { %p34_p1 = scmp.ge.s32.totalorder %s32_s15, 8  ;;  %p190_p2 = scmp.lt.s32.totalorder %s614_s14, 9 }
   0x5   : > { %s703_s15 = smov (%p34_p1, %s32_s15), 0  ;;  %p191_p3 = pnand %p531_p0, %p190_p2 }
   0x6   : > { %p232_p4 = scmp.lt.s32.totalorder (!%p191_p3), %s606_s12, 7  ;;  %vm268_vm0 = vcmask (!%p191_p3), 64512   ;;  %v616_v0 = vmov (!%p191_p3), 0.0   ;;  %vm617_vm1 = vmmov (!%p191_p3), 0   ;;  %vm265_vm2 = vcmask (!%p191_p3), 7168  }
   0x7   : > { %194 = sbr.rel (%p191_p3) target bundleno = 823 (0x337), region = 32  ;;  %544 = vmatprep.subr.bf16.mxu0 (!%p191_p3), %v616_v0  ;;  %269 = vst.msk [vmem:[#allocation4] sm:$0xff] (!%p191_p3), %vm268_vm0, %v616_v0  ;;  %546 = vmatprep.mubr.msk.bf16.mxu0 (!%p191_p3), %vm617_vm1, %v616_v0  ;;  %v618_v7 = vmov (!%p191_p3), -1e+30   ;;  %v619_v13 = vmov (!%p191_p3), 0   ;;  %vm358_vm3 = vcmask (!%p191_p3), 1043456  }
   0x8   : > { %550 = vmatprep.subr.bf16.mxu1 (!%p191_p3), %v616_v0  ;;  %552 = vmatprep.mubr.msk.bf16.mxu1 (!%p191_p3), %vm617_vm1, %v616_v0  ;;  %266 = vst.msk [vmem:[#allocation2] sm:$0xff] (!%p191_p3), %vm265_vm2, %v618_v7  ;;  %267 = vst.msk [vmem:[#allocation3] sm:$0xff] (!%p191_p3), %vm265_vm2, %v616_v0  ;;  %vm418_vm4 = vcmask (!%p191_p3), 60416  }
   0x9   : > { %584 = vset.pattern.permute.xlu0 (!%p191_p3), %v619_v13  ;;  %585 = vset.pattern.permute.xlu1 (!%p191_p3), %v619_v13 }
   0xe   : > { %s705_s12 = smov (!%p232_p4, %s606_s12), 7  ;;  %v347_v34 = vld [vmem:[#allocation4] sm:$0xff] }
   0xf   : > { %s659_s16 = sshll.u32 %s705_s12, 2  ;;  %v323_v14 = vld [vmem:[#allocation2] sm:$0xff]  ;;  %v339_v28 = vld [vmem:[#allocation3] sm:$0xff] }
  0x10   : > { %s245_s19 = scalar_lea.vmem %s697_s1, %s659_s16  ;;  %s238_s22 = scalar_lea.vmem %s696_s0, %s659_s16 }
  0x11   : > { %v274_v1 = vld [vmem:[%s245_s19] sm:$0xf]  ;;  %s252_s25 = scalar_lea.vmem %s698_s2, %s659_s16  ;;  %s259_s28 = scalar_lea.vmem %s699_s3, %s659_s16 }
  0x12   : > { %v270_v2 = vld [vmem:[%s238_s22] sm:$0xf]  ;;  %v281_v3 = vsel %vm268_vm0, %v274_v1, 0 }
  0x13   : > { %v271_v4 = vunpack.c.l.bf16 %v270_v2  ;;  %545 = vmatpush3.bf16.xpose.msra.mxu0 %v281_v3  ;;  %v275_v18 = vld [vmem:[%s252_s25] sm:$0xf] }
  0x14   : > { %v360_v19 = vsel %vm358_vm3, %v275_v18, 0 }
  0x15   : > { %v272_v5 = vmul.f32 0.35355338, %v271_v4  ;;  %551 = vmatpush3.bf16.msra.mxu1 %v360_v19 }
  0x17   : > { %v273_v6 = vpack.c.bf16 %v272_v5, %v272_v5 }
  0x1a   : > { %547 = vmatmul.mubr.msk.bf16.vlgmr.msra.gmra.mrb[0].mxu0 %vm268_vm0, %v273_v6 }
  0xed   : > { %v317_v8 = vpop.f32.mrb[0].mxu0 }
  0xee   : > { %v548_v9 = vpop.f32.mrb[1].mxu0  ;;  %v324_v10 = vsel %vm268_vm0, %v317_v8, -inf }
  0xef   : > { %325 = vmax.xlane.f32.xlu0 %v324_v10  ;;  %v320_v11 = vpop.f32.mrb[2].mxu0 }
  0xf0   : > { %v549_v12 = vpop.f32.mrb[3].mxu0 }
 0x17c   : > { %v326_v15 = vpop.xlane.xlu0 %325 }
 0x17d   : > { %v327_v16 = vmax.f32 %v323_v14, %v326_v15 }
 0x17f   : > { %v328_v17 = vsub.f32 %v323_v14, %v327_v16  ;;  %404 = vst.msk [vmem:[#allocation2] sm:$0xff] %vm265_vm2, %v327_v16  ;;  %333 = vperm.xlu0 %584, %v327_v16  }
 0x181   : > { %v329_v26 = vmul.f32 1.442695, %v328_v17 }
 0x1fe   : > { %v334_v20 = vpop.permute.xlu0 %333 }
 0x1ff   : > { %v336_v21 = vsub.f32 %v317_v8, %v334_v20 }
 0x201   : > { %v337_v22 = vmul.f32 1.442695, %v336_v21 }
 0x203   : > { %586 = vpow2.f32 %v337_v22 }
 0x204   : > { %588 = vpow2.f32 %v329_v26 }
 0x20d   : > { %v587_v23 = vpop.eup %586 }
 0x20e   : > { %v341_v24 = vsel %vm268_vm0, %v587_v23, 0.0  ;;  %v354_v25 = vpack.c.bf16 %v587_v23, %v587_v23  ;;  %v589_v27 = vpop.eup %588 }
 0x20f   : > { %342 = vadd.xlane.f32.xlu1 %v341_v24  ;;  %v340_v29 = vmul.f32 %v589_v27, %v339_v28 }
 0x210   : > { %553 = vmatmul.mubr.msk.bf16.vlgmr.msra.gmra.mrb[0].mxu1 %vm268_vm0, %v354_v25 }
 0x220   : > { %350 = vperm.xlu1 %585, %v589_v27  }
 0x29c   : > { %v343_v30 = vpop.xlane.xlu1 %342 }
 0x29d   : > { %v344_v31 = vadd.f32 %v343_v30, %v340_v29 }
 0x29f   : > { %346 = vst.msk [vmem:[#allocation3] sm:$0xff] %vm265_vm2, %v344_v31 }
 0x2a0   : > { %v351_v35 = vpop.permute.xlu1 %350 }
 0x2a1   : > { %v353_v36 = vmul.f32 %v351_v35, %v347_v34 }
 0x2a6   : > { %v408_v32 = vld [vmem:[#allocation3] sm:$0xff] }
 0x2a7   : > { %590 = vrcp.f32 %v408_v32 }
 0x2b1   : > { %v591_v33 = vpop.eup %590 }
 0x2b2   : > { %413 = vperm.xlu1 %585, %v591_v33  }
 0x2e3   : > { %v396_v37 = vpop.f32.mrb[0].mxu1 }
 0x2e4   : > { %v402_v38 = vadd.f32 %v396_v37, %v353_v36  ;;  %v554_v39 = vpop.f32.mrb[1].mxu1 }
 0x2e5   : > { %v399_v40 = vpop.f32.mrb[2].mxu1 }
 0x2e6   : > { %403 = vst.msk [vmem:[#allocation4] sm:$0xff] %vm268_vm0, %v402_v38  ;;  %v555_v41 = vpop.f32.mrb[3].mxu1 }
 0x2ed   : > { %v410_v42 = vld [vmem:[#allocation4] sm:$0xff] }
 0x331   : > { %v414_v43 = vpop.permute.xlu1 %413 }
 0x332   : > { %v416_v44 = vmul.f32 %v414_v43, %v410_v42 }
 0x334   : > { %v417_v45 = vpack.c.bf16 %v416_v44, %v416_v44 }
 0x336   : > { %419 = vst.msk [vmem:[%s259_s28] sm:$0xf] %vm418_vm4, %v417_v45 }
 0x337 PF: > { %s13_s14 = sadd.s32 1, %s614_s14   ;;  %s700_s12 = smov %s610_s13 }
 0x338   : > { %p10_p5 = scmp.ge.s32.totalorder %s13_s14, 10   ;;  %s701_s13 = smov %s703_s15 }
 0x33a   :  { %12 = sbr.rel (!%p10_p5) target bundleno = 2 (0x2), region = 76 }

// kernel: transformer_forward.42
= control target key start
LH: loop header
LB: loop body
LE: loop exit
PB: predicated region body
PF: predicated region fallthrough
CT: control target
= control target key end

     0   :  { %vm19_vm0 = vcmask 523264   ;;  %v145_v0 = vmov 0.0   ;;  %vm146_vm1 = vmmov 0   ;;  %vm43_vm2 = vcmask 261120   ;;  %s192_s1 = inlined_call_operand.vmem [shape: bf16[32,64], index: 1, kind: input, shape index: {}]   ;;  %s193_s0 = inlined_call_operand.vmem [shape: f32[16,32], index: 0, kind: input, shape index: {}]   ;;  %s194_s2 = inlined_call_operand.vmem [shape: f32[1,64], index: 2, kind: input, shape index: {}]   ;;  %s195_s3 = inlined_call_operand.vmem [shape: bf16[16,64], index: 3, kind: output, shape index: {}]  }
   0x1   :  { %133 = vmatprep.subr.bf16.mxu0 %v145_v0  ;;  %v143_v1 = vld [vmem:[%s192_s1] sm:$0xff]   ;;  %137 = vmatprep.mubr.msk.bf16.mxu0 %vm146_vm1, %v145_v0  ;;  %20 = vst.msk [vmem:[#allocation2] sm:$0xff] %vm19_vm0, %v145_v0  ;;  %21 = vst.msk [vmem:[#allocation2 + $0x8] sm:$0xff] %vm19_vm0, %v145_v0  ;;  %v144_v2 = vld [vmem:[%s192_s1 + $0x8] sm:$0xff]   ;;  %vm115_vm3 = vcmask 519168  }
   0x2   :  { %134 = vmatpush3.bf16.msra.mxu0 %v143_v1  ;;  %v24_v3 = vld [vmem:[%s193_s0] sm:$0xff]  ;;  %v25_v4 = vld [vmem:[%s193_s0 + $0x8] sm:$0xff] }
   0x3   :  { %135 = vmatprep.subr.bf16.mxu0 %v145_v0  ;;  %v26_v5 = vpack.c.bf16 %v25_v4, %v24_v3  ;;  %v125_v14 = vld [vmem:[%s194_s2] ss:$0 sm:$0xff] }
   0x6   :  { %136 = vmatpush3.bf16.msra.mxu0 %v144_v2 }
   0x8   :  { %v22_v6 = vld [vmem:[#allocation2] sm:$0xff]  ;;  %v23_v8 = vld [vmem:[#allocation2 + $0x8] sm:$0xff] }
   0x9   :  { %138 = vmatmul.mubr.msk.bf16.vlgmr.msra.gmra.mrb[0].mxu0 %vm43_vm2, %v26_v5 }
  0xdc   :  { %v81_v7 = vpop.f32.mrb[0].mxu0 }
  0xdd   :  { %v88_v9 = vadd.f32 %v81_v7, %v22_v6  ;;  %v139_v10 = vpop.f32.mrb[1].mxu0 }
  0xde   :  { %v84_v11 = vpop.f32.mrb[2].mxu0 }
  0xdf   :  { %91 = vst.msk [vmem:[#allocation2] sm:$0xff] %vm19_vm0, %v88_v9  ;;  %v89_v12 = vadd.f32 %v84_v11, %v23_v8  ;;  %v140_v13 = vpop.f32.mrb[3].mxu0 }
  0xe1   :  { %92 = vst.msk [vmem:[#allocation2 + $0x8] sm:$0xff] %vm19_vm0, %v89_v12 }
  0xe6   :  { %v96_v15 = vld [vmem:[#allocation2] sm:$0xff] }
  0xe7   :  { %v105_v16 = vadd.f32 %v125_v14, %v96_v15 }
  0xe8   :  { %v97_v17 = vld [vmem:[#allocation2 + $0x8] sm:$0xff] }
  0xe9   :  { %v128_v18 = vpack.c.bf16 %v105_v16, %v105_v16  ;;  %v106_v19 = vadd.f32 %v125_v14, %v97_v17 }
  0xeb   :  { %116 = vst.msk [vmem:[%s195_s3] sm:$0xf] %vm115_vm3, %v128_v18  ;;  %v129_v20 = vpack.c.bf16 %v106_v19, %v106_v19 }
  0xed   :  { %117 = vst.msk [vmem:[%s195_s3 + $0x4] sm:$0xf] %vm115_vm3, %v129_v20 }

// kernel: transformer_forward.32
= control target key start
LH: loop header
LB: loop body
LE: loop exit
PB: predicated region body
PF: predicated region fallthrough
CT: control target
= control target key end

     0   :  { %vm28_vm0 = vcmask 261120   ;;  %v282_v0 = vmov 0.0   ;;  %vm283_vm1 = vmmov 0   ;;  %s377_s1 = inlined_call_operand.vmem [shape: bf16[128,32], index: 1, kind: input, shape index: {}]   ;;  %s378_s0 = inlined_call_operand.vmem [shape: bf16[16,128], index: 0, kind: input, shape index: {}]   ;;  %s379_s2 = inlined_call_operand.vmem [shape: f32[1,32], index: 2, kind: input, shape index: {}]   ;;  %s380_s3 = inlined_call_operand.vmem [shape: f32[16,32], index: 3, kind: input, shape index: {}]   ;;  %s381_s4 = inlined_call_operand.vmem [shape: f32[1,32], index: 4, kind: input, shape index: {}]   ;;  %s382_s5 = inlined_call_operand.vmem [shape: f32[1,32], index: 5, kind: input, shape index: {}]   ;;  %s383_s6 = inlined_call_operand.vmem [shape: f32[16,32], index: 6, kind: output, shape index: {}]  }
   0x1   :  { %247 = vmatprep.subr.bf16.mxu0 %v282_v0  ;;  %v269_v1 = vld [vmem:[%s377_s1] sm:$0xff]   ;;  %263 = vmatprep.mubr.msk.bf16.mxu0 %vm283_vm1, %v282_v0  ;;  %29 = vst.msk [vmem:[#allocation2] sm:$0xff] %vm28_vm0, %v282_v0  ;;  %30 = vst.msk [vmem:[#allocation2 + $0x8] sm:$0xff] %vm28_vm0, %v282_v0  ;;  %v270_v2 = vld [vmem:[%s377_s1 + $0x8] sm:$0xff]  }
   0x2   :  { %248 = vmatpush3.bf16.msra.mxu0 %v269_v1  ;;  %v271_v3 = vld [vmem:[%s377_s1 + $0x10] sm:$0xff]   ;;  %v272_v4 = vld [vmem:[%s377_s1 + $0x18] sm:$0xff]   ;;  %v273_v5 = vld [vmem:[%s377_s1 + $0x20] sm:$0xff]  }
   0x3   :  { %249 = vmatprep.subr.bf16.mxu0 %v282_v0  ;;  %v274_v6 = vld [vmem:[%s377_s1 + $0x28] sm:$0xff]   ;;  %v275_v7 = vld [vmem:[%s377_s1 + $0x30] sm:$0xff]   ;;  %v276_v8 = vld [vmem:[%s377_s1 + $0x38] sm:$0xff]  }
   0x4   :  { %v277_v9 = vld [vmem:[%s378_s0] sm:$0xff]   ;;  %v166_v23 = vld [vmem:[%s380_s3 + $0x8] sm:$0xff] }
   0x5   :  { %v235_v18 = vld [vmem:[%s379_s2] ss:$0 sm:$0xff] }
   0x6   :  { %250 = vmatpush3.bf16.msra.mxu0 %v270_v2  ;;  %v165_v20 = vld [vmem:[%s380_s3] sm:$0xff] }
   0x7   :  { %251 = vmatprep.subr.bf16.mxu0 %v282_v0  ;;  %v236_v51 = vld [vmem:[%s381_s4] ss:$0 sm:$0xff] }
   0x8   :  { %v31_v10 = vld [vmem:[#allocation2] sm:$0xff]  ;;  %v32_v12 = vld [vmem:[#allocation2 + $0x8] sm:$0xff] }
   0x9   :  { %v237_v53 = vld [vmem:[%s382_s5] ss:$0 sm:$0xff] }
   0xa   :  { %252 = vmatpush3.bf16.msra.mxu0 %v271_v3 }
   0xb   :  { %253 = vmatprep.subr.bf16.mxu0 %v282_v0 }
   0xe   :  { %254 = vmatpush3.bf16.msra.mxu0 %v272_v4 }
   0xf   :  { %255 = vmatprep.subr.bf16.mxu0 %v282_v0 }
  0x12   :  { %256 = vmatpush3.bf16.msra.mxu0 %v273_v5 }
  0x13   :  { %257 = vmatprep.subr.bf16.mxu0 %v282_v0 }
  0x16   :  { %258 = vmatpush3.bf16.msra.mxu0 %v274_v6 }
  0x17   :  { %259 = vmatprep.subr.bf16.mxu0 %v282_v0 }
  0x1a   :  { %260 = vmatpush3.bf16.msra.mxu0 %v275_v7 }
  0x1b   :  { %261 = vmatprep.subr.bf16.mxu0 %v282_v0 }
  0x1e   :  { %262 = vmatpush3.bf16.msra.mxu0 %v276_v8 }
  0x21   :  { %264 = vmatmul.mubr.bf16.vlgmr.msra.gmra.mrb[0].mxu0 %v277_v9 }
  0xf4   :  { %v139_v11 = vpop.f32.mrb[0].mxu0 }
  0xf5   :  { %v146_v13 = vadd.f32 %v139_v11, %v31_v10  ;;  %v265_v14 = vpop.f32.mrb[1].mxu0 }
  0xf6   :  { %v142_v15 = vpop.f32.mrb[2].mxu0 }
  0xf7   :  { %149 = vst.msk [vmem:[#allocation2] sm:$0xff] %vm28_vm0, %v146_v13  ;;  %v147_v16 = vadd.f32 %v142_v15, %v32_v12  ;;  %v266_v17 = vpop.f32.mrb[3].mxu0 }
  0xf9   :  { %150 = vst.msk [vmem:[#allocation2 + $0x8] sm:$0xff] %vm28_vm0, %v147_v16 }
  0xfe   :  { %v154_v19 = vld [vmem:[#allocation2] sm:$0xff] }
  0xff   :  { %v163_v21 = vadd.f32 %v235_v18, %v154_v19 }
 0x100   :  { %v155_v22 = vld [vmem:[#allocation2 + $0x8] sm:$0xff] }
 0x101   :  { %v167_v24 = vadd.f32 %v165_v20, %v163_v21  ;;  %v164_v25 = vadd.f32 %v235_v18, %v155_v22 }
 0x103   :  { %v169_v26 = vsel %vm28_vm0, %v167_v24, 0.0  ;;  %v178_v27 = vmul.f32 %v167_v24, %v167_v24  ;;  %v168_v28 = vadd.f32 %v166_v23, %v164_v25 }
 0x104   :  { %170 = vadd.xlane.f32.xlu0 %v169_v26 }
 0x105   :  { %v180_v29 = vsel %vm28_vm0, %v178_v27, 0.0  ;;  %v179_v30 = vmul.f32 %v168_v28, %v168_v28  ;;  %v172_v31 = vsel %vm28_vm0, %v168_v28, 0.0 }
 0x106   :  { %181 = vadd.xlane.f32.xlu1 %v180_v29 }
 0x107   :  { %v183_v32 = vsel %vm28_vm0, %v179_v30, 0.0 }
 0x108   :  { %173 = vadd.xlane.f32.xlu0 %v172_v31 }
 0x10a   :  { %184 = vadd.xlane.f32.xlu1 %v183_v32 }
 0x191   :  { %v171_v33 = vpop.xlane.xlu0 %170 }
 0x192   :  { %v176_v34 = vmul.f32 0.03125, %v171_v33 }
 0x193   :  { %v182_v35 = vpop.xlane.xlu1 %181 }
 0x194   :  { %v188_v36 = vmul.f32 %v176_v34, %v176_v34  ;;  %v186_v37 = vmul.f32 0.03125, %v182_v35  ;;  %v194_v49 = vsub.f32 %v167_v24, %v176_v34 }
 0x195   :  { %v174_v38 = vpop.xlane.xlu0 %173 }
 0x196   :  { %v190_v39 = vsub.f32 %v186_v37, %v188_v36  ;;  %v177_v40 = vmul.f32 0.03125, %v174_v38 }
 0x197   :  { %v185_v41 = vpop.xlane.xlu1 %184 }
 0x198   :  { %v192_v42 = vmax.f32 %v190_v39, 0.0  ;;  %v189_v43 = vmul.f32 %v177_v40, %v177_v40  ;;  %v187_v44 = vmul.f32 0.03125, %v185_v41  ;;  %v195_v55 = vsub.f32 %v168_v28, %v177_v40 }
 0x19a   :  { %v196_v45 = vadd.f32 1e-05, %v192_v42  ;;  %v191_v46 = vsub.f32 %v187_v44, %v189_v43 }
 0x19c   :  { %278 = vrsqrt.f32 %v196_v45  ;;  %v193_v47 = vmax.f32 %v191_v46, 0.0 }
 0x19e   :  { %v197_v48 = vadd.f32 1e-05, %v193_v47 }
 0x1a0   :  { %280 = vrsqrt.f32 %v197_v48 }
 0x1a6   :  { %v279_v50 = vpop.eup %278 }
 0x1a7   :  { %v200_v52 = vmul.f32 %v279_v50, %v194_v49 }
 0x1a9   :  { %v209_v54 = vmul.f32 %v236_v51, %v200_v52 }
 0x1aa   :  { %v281_v56 = vpop.eup %280 }
 0x1ab   :  { %v218_v57 = vadd.f32 %v237_v53, %v209_v54  ;;  %v201_v58 = vmul.f32 %v281_v56, %v195_v55 }
 0x1ad   :  { %220 = vst.msk [vmem:[%s383_s6] sm:$0xff] %vm28_vm0, %v218_v57  ;;  %v210_v59 = vmul.f32 %v236_v51, %v201_v58 }
 0x1af   :  { %v219_v60 = vadd.f32 %v237_v53, %v210_v59 }
 0x1b1   :  { %221 = vst.msk [vmem:[%s383_s6 + $0x8] sm:$0xff] %vm28_vm0, %v219_v60 }

// kernel: transformer_forward.55
= control target key start
LH: loop header
LB: loop body
LE: loop exit
PB: predicated region body
PF: predicated region fallthrough
CT: control target
= control target key end

     0   :  { %v322_v1 = vmov 0.0   ;;  %vm323_vm0 = vmmov 0   ;;  %vm29_vm1 = vcmask 261120   ;;  %s426_s0 = inlined_call_operand.vmem [shape: bf16[16,128], index: 0, kind: input, shape index: {}]   ;;  %s427_s1 = inlined_call_operand.vmem [shape: bf16[128,32], index: 1, kind: input, shape index: {}]   ;;  %s428_s2 = inlined_call_operand.vmem [shape: f32[1,32], index: 2, kind: input, shape index: {}]   ;;  %s429_s3 = inlined_call_operand.vmem [shape: f32[16,32], index: 3, kind: input, shape index: {}]   ;;  %s430_s4 = inlined_call_operand.vmem [shape: f32[1,32], index: 4, kind: input, shape index: {}]   ;;  %s431_s5 = inlined_call_operand.vmem [shape: f32[1,32], index: 5, kind: input, shape index: {}]   ;;  %s432_s6 = inlined_call_operand.hbm [shape: f32[16,32], index: 6, kind: output, shape index: {}]  }
   0x1   :  { %v285_v0 = vld [vmem:[%s427_s1] sm:$0xff]   ;;  %260 = vmatprep.subr.bf16.mxu0 %v322_v1  ;;  %v286_v2 = vld [vmem:[%s427_s1 + $0x8] sm:$0xff]   ;;  %276 = vmatprep.mubr.msk.bf16.mxu0 %vm323_vm0, %v322_v1  ;;  %30 = vst.msk [vmem:[#allocation2] sm:$0xff] %vm29_vm1, %v322_v1  ;;  %31 = vst.msk [vmem:[#allocation2 + $0x8] sm:$0xff] %vm29_vm1, %v322_v1 }
   0x2   :  { %261 = vmatpush3.bf16.msra.mxu0 %v285_v0  ;;  %v287_v3 = vld [vmem:[%s427_s1 + $0x10] sm:$0xff]  }
   0x3   :  { %262 = vmatprep.subr.bf16.mxu0 %v322_v1 }
   0x6   :  { %263 = vmatpush3.bf16.msra.mxu0 %v286_v2 }
   0x7   :  { %264 = vmatprep.subr.bf16.mxu0 %v322_v1 }
   0x8   :  { %11 = vsyncpa [#allocation4], 0  ;;  %v288_v4 = vld [vmem:[%s427_s1 + $0x18] sm:$0xff]   ;;  %v289_v5 = vld [vmem:[%s427_s1 + $0x20] sm:$0xff]   ;;  %s324_s21 = smov [#allocation3]  }
   0x9   :  { %v290_v6 = vld [vmem:[%s427_s1 + $0x28] sm:$0xff]   ;;  %v291_v7 = vld [vmem:[%s427_s1 + $0x30] sm:$0xff]   ;;  %v292_v8 = vld [vmem:[%s427_s1 + $0x38] sm:$0xff]   ;;  %s228_s22 = sshll.u32 %s324_s21, 4  ;;  %s229_s22 = int_to_ptr.vmem [resolvable:$true] %s228_s22 }
   0xa   :  { %265 = vmatpush3.bf16.msra.mxu0 %v287_v3  ;;  %v293_v9 = vld [vmem:[%s426_s0] sm:$0xff]   ;;  %v33_v12 = vld [vmem:[#allocation2 + $0x8] sm:$0xff]  ;;  %p303_p1 = scmp.lt.s32.totalorder %s229_s22, %s229_s22 }
   0xb   :  { %266 = vmatprep.subr.bf16.mxu0 %v322_v1  ;;  %v32_v10 = vld [vmem:[#allocation2] sm:$0xff]  ;;  %v167_v23 = vld [vmem:[%s429_s3 + $0x8] sm:$0xff] }
   0xc   :  { %v248_v18 = vld [vmem:[%s428_s2] ss:$0 sm:$0xff] }
   0xd   :  { %v166_v20 = vld [vmem:[%s429_s3] sm:$0xff] }
   0xe   :  { %267 = vmatpush3.bf16.msra.mxu0 %v288_v4  ;;  %v249_v51 = vld [vmem:[%s430_s4] ss:$0 sm:$0xff]  ;;  %s298_s4 = scalar_lea.vmem %s229_s22, 256 }
   0xf   :  { %268 = vmatprep.subr.bf16.mxu0 %v322_v1  ;;  %v250_v53 = vld [vmem:[%s431_s5] ss:$0 sm:$0xff]  ;;  %p299_p0 = scmp.ne.s32.totalorder %s229_s22, %s298_s4  ;;  %p304_p2 = scmp.lt.s32.totalorder %s298_s4, %s298_s4 }
  0x11   :  { %p305_p3 = por %p304_p2, %p303_p1 }
  0x12   :  { %269 = vmatpush3.bf16.msra.mxu0 %v289_v5 }
  0x13   :  { %270 = vmatprep.subr.bf16.mxu0 %v322_v1  ;;  %p306_p4 = pnand %p305_p3, %p299_p0 }
  0x16   :  { %271 = vmatpush3.bf16.msra.mxu0 %v290_v6 }
  0x17   :  { %272 = vmatprep.subr.bf16.mxu0 %v322_v1 }
  0x1a   :  { %273 = vmatpush3.bf16.msra.mxu0 %v291_v7 }
  0x1b   :  { %274 = vmatprep.subr.bf16.mxu0 %v322_v1 }
  0x1e   :  { %275 = vmatpush3.bf16.msra.mxu0 %v292_v8 }
  0x21   :  { %277 = vmatmul.mubr.bf16.vlgmr.msra.gmra.mrb[0].mxu0 %v293_v9 }
  0xf4   :  { %v140_v11 = vpop.f32.mrb[0].mxu0 }
  0xf5   :  { %v147_v13 = vadd.f32 %v140_v11, %v32_v10  ;;  %v278_v14 = vpop.f32.mrb[1].mxu0 }
  0xf6   :  { %v143_v15 = vpop.f32.mrb[2].mxu0 }
  0xf7   :  { %150 = vst.msk [vmem:[#allocation2] sm:$0xff] %vm29_vm1, %v147_v13  ;;  %v148_v16 = vadd.f32 %v143_v15, %v33_v12  ;;  %v279_v17 = vpop.f32.mrb[3].mxu0 }
  0xf9   :  { %151 = vst.msk [vmem:[#allocation2 + $0x8] sm:$0xff] %vm29_vm1, %v148_v16 }
  0xfe   :  { %v155_v19 = vld [vmem:[#allocation2] sm:$0xff] }
  0xff   :  { %v164_v21 = vadd.f32 %v248_v18, %v155_v19 }
 0x100   :  { %v156_v22 = vld [vmem:[#allocation2 + $0x8] sm:$0xff] }
 0x101   :  { %v168_v24 = vadd.f32 %v166_v20, %v164_v21  ;;  %v165_v25 = vadd.f32 %v248_v18, %v156_v22 }
 0x103   :  { %v170_v26 = vsel %vm29_vm1, %v168_v24, 0.0  ;;  %v179_v27 = vmul.f32 %v168_v24, %v168_v24  ;;  %v169_v28 = vadd.f32 %v167_v23, %v165_v25 }
 0x104   :  { %171 = vadd.xlane.f32.xlu0 %v170_v26 }
 0x105   :  { %v181_v29 = vsel %vm29_vm1, %v179_v27, 0.0  ;;  %v180_v30 = vmul.f32 %v169_v28, %v169_v28  ;;  %v173_v31 = vsel %vm29_vm1, %v169_v28, 0.0 }
 0x106   :  { %182 = vadd.xlane.f32.xlu1 %v181_v29 }
 0x107   :  { %v184_v32 = vsel %vm29_vm1, %v180_v30, 0.0 }
 0x108   :  { %174 = vadd.xlane.f32.xlu0 %v173_v31 }
 0x10a   :  { %185 = vadd.xlane.f32.xlu1 %v184_v32 }
 0x191   :  { %v172_v33 = vpop.xlane.xlu0 %171 }
 0x192   :  { %v177_v34 = vmul.f32 0.03125, %v172_v33 }
 0x193   :  { %v183_v35 = vpop.xlane.xlu1 %182 }
 0x194   :  { %v189_v36 = vmul.f32 %v177_v34, %v177_v34  ;;  %v187_v37 = vmul.f32 0.03125, %v183_v35  ;;  %v195_v49 = vsub.f32 %v168_v24, %v177_v34 }
 0x195   :  { %v175_v38 = vpop.xlane.xlu0 %174 }
 0x196   :  { %v191_v39 = vsub.f32 %v187_v37, %v189_v36  ;;  %v178_v40 = vmul.f32 0.03125, %v175_v38 }
 0x197   :  { %v186_v41 = vpop.xlane.xlu1 %185 }
 0x198   :  { %v193_v42 = vmax.f32 %v191_v39, 0.0  ;;  %v190_v43 = vmul.f32 %v178_v40, %v178_v40  ;;  %v188_v44 = vmul.f32 0.03125, %v186_v41  ;;  %v196_v54 = vsub.f32 %v169_v28, %v178_v40 }
 0x19a   :  { %v197_v45 = vadd.f32 1e-05, %v193_v42  ;;  %v192_v46 = vsub.f32 %v188_v44, %v190_v43 }
 0x19c   :  { %294 = vrsqrt.f32 %v197_v45  ;;  %v194_v47 = vmax.f32 %v192_v46, 0.0 }
 0x19e   :  { %v198_v48 = vadd.f32 1e-05, %v194_v47 }
 0x1a0   :  { %296 = vrsqrt.f32 %v198_v48 }
 0x1a6   :  { %v295_v50 = vpop.eup %294 }
 0x1a7   :  { %v201_v52 = vmul.f32 %v295_v50, %v195_v49 }
 0x1a9   :  { %v210_v55 = vmul.f32 %v249_v51, %v201_v52 }
 0x1aa   :  { %v297_v56 = vpop.eup %296 }
 0x1ab   :  { %v202_v57 = vmul.f32 %v297_v56, %v196_v54  ;;  %v219_v58 = vadd.f32 %v250_v53, %v210_v55 }
 0x1ad   :  { %v211_v59 = vmul.f32 %v249_v51, %v202_v57  ;;  %221 = vst.msk [vmem:[#allocation3] sm:$0xff] %vm29_vm1, %v219_v58 }
 0x1af   :  { %v220_v60 = vadd.f32 %v250_v53, %v211_v59 }
 0x1b1   :  { %222 = vst.msk [vmem:[#allocation3 + $0x8] sm:$0xff] %vm29_vm1, %v220_v60 }
 0x1b2   :  { %309 = shalt.err (!%p306_p4)
}
 0x1b3   :  { %s310_s24 = scalar_lea.hbm %s432_s6, 256 }
 0x1b4   :  { %p311_p5 = scmp.ne.s32.totalorder %s432_s6, %s310_s24  ;;  %p314_p6 = scmp.lt.u32.totalorder %s310_s24, %s432_s6 }
 0x1b6   :  { %p316_p7 = pnand %p314_p6, %p311_p5 }
 0x1b8   :  { %319 = shalt.err (!%p316_p7)
}
 0x1b9   :  { %s325_s29 = smov 128   ;;  %s326_s30 = smov 8  }
 0x1ba   :  { %234 = dma.vmem_to_hbm [thread:$0]  %s229_s22, 256, %s432_s6, [#allocation4], %s325_s29, %s325_s29, %s326_s30  }
 0x1bb   :  { %320 = dma.done.wait [#allocation4], 256  }
 0x1bc   :  { %321 = vsyncadd [#allocation4], 4294967040 }
 0x1bd   :  { %238 = vsyncpa [#allocation4], 1 }

</bundles_post_ra>
